<compile_context>
chip_gen: v7x
topology: tpu7x:2x2x1
jax: 0.10.0
libtpu: 0.0.40
codegen_flags: <defaults>
</compile_context>

<pallas_src>
import numpy as np
import jax
import jax.numpy as jnp
from jax import lax
from jax.experimental import pallas as pl
from jax.experimental.pallas import tpu as pltpu

_EPS = 1e-7


# ---------------------------------- Pallas kernel ----------------------------------

def _mobius_linear_kernel(k_ref, x_ref, wT_ref, bh_ref, out_ref):
    num_block = x_ref.shape[0]
    k = k_ref[0, 0]                                    # curvature scalar (SMEM)
    sqrt_k = jnp.sqrt(k)
    inv_sqrt_k = 1.0 / sqrt_k                          # scalar divide, negligible

    op1p = out_ref.shape[-1]
    # (1, op1p) time mask (lane 0), broadcast inside jnp.where (low vreg pressure).
    tmask = lax.broadcasted_iota(jnp.int32, (1, op1p), 1) == 0

    def linner(u, v):
        # Lorentz inner <u,v>_L = -u0*v0 + sum_{i>=1} ui*vi == sum(u*v) - 2*(u*v)[...,0]
        uv = u * v
        return jnp.sum(uv, axis=-1, keepdims=True) - 2.0 * uv[..., 0:1]

    def cosh_sinh(theta):
        # Exact exp(-theta) (NOT an approximate reciprocal): for near-zero tangents the
        # sinh cancellation would otherwise be dominated by the ~2^-12 vrcp error.
        e = jnp.exp(theta)
        ie = jnp.exp(-theta)
        # NOTE: exp overflows for theta > ~88 (same behavior as the torch reference path).
        return 0.5 * (e + ie), 0.5 * (e - ie)

    def expmap0(u):
        nomin = jnp.sqrt(jnp.maximum(linner(u, u), 1e-8))
        ch, sh = cosh_sinh(nomin * inv_sqrt_k)
        r_v = (sqrt_k * sh * pl.reciprocal(nomin, approx=True)) * u
        return jnp.where(tmask, r_v + ch * sqrt_k, r_v)

    def logmap0(y):
        alpha = jnp.maximum(y[..., 0:1] * inv_sqrt_k, 1.0 + _EPS)
        sq = (alpha - 1.0) * (alpha + 1.0)             # alpha^2 - 1 without cancellation
        rs = lax.rsqrt(sq)
        coef = jnp.log(alpha + sq * rs) * rs           # arccosh(alpha) / sqrt(alpha^2 - 1)
        return jnp.where(tmask, 0.0, coef * y)

    def expmap(x, u):
        nomin = jnp.sqrt(jnp.maximum(linner(u, u), 1e-8))
        ch, sh = cosh_sinh(nomin * inv_sqrt_k)
        return ch * x + (sqrt_k * sh * pl.reciprocal(nomin, approx=True)) * u

    def ptransp0(x, v):
        # parallel transport of tangent v from the origin o = (sqrt_k, 0, ..., 0) to x
        coef = linner(x, v) * pl.reciprocal(k + sqrt_k * x[..., 0:1], approx=True)
        return v + coef * jnp.where(tmask, x + sqrt_k, x)

    def mobius_add(x, y):
        return expmap(x, ptransp0(x, logmap0(y)))

    def block_mv(blk):
        # Time row of W^T (multiplying x's identically-zero time slot) was dropped in the
        # wrapper, so the (already bf16/f32) raw features feed the MXU directly.
        mu = jnp.dot(x_ref[blk], wT_ref[blk], preferred_element_type=jnp.float32)
        return expmap0(mu)                             # mobius_matvec(W_blk, expmap0(u_blk))

    output = block_mv(0)
    if num_block > 1:
        if num_block <= 8:                             # small & static -> unroll
            for blk in range(1, num_block):
                output = mobius_add(output, block_mv(blk))
        else:                                          # large -> bounded live ranges
            output = lax.fori_loop(1, num_block,
                                   lambda blk, o: mobius_add(o, block_mv(blk)), output)

    # bias point expmap0(bias) is grid-invariant and precomputed in the wrapper
    output = mobius_add(output, bh_ref[...])
    t = logmap0(output)                                # tangent at origin, t[:, 0] == 0

    # sigmoid(t) = 0.5*tanh(0.5*t)+0.5 : one EUP op on the full tile (vs exp + reciprocal).
    out_ref[...] = (0.5 * jnp.tanh(0.5 * t) + 0.5).astype(out_ref.dtype)


# --------------------- shared pure-JAX Lorentz helpers (host / reference) ---------------------

def _j_tmask(n):
    return jnp.arange(n) == 0


def _j_linner(u, v):
    uv = u * v
    return jnp.sum(uv[..., 1:], axis=-1, keepdims=True) - uv[..., 0:1]


def _j_expmap0(u, k):
    sqrt_k = jnp.sqrt(k)
    nomin = jnp.sqrt(jnp.maximum(_j_linner(u, u), 1e-8))
    theta = nomin / sqrt_k
    r_v = sqrt_k * jnp.sinh(theta) / nomin * u
    return jnp.where(_j_tmask(u.shape[-1]), r_v + jnp.cosh(theta) * sqrt_k, r_v)


def _j_logmap0(y, k):
    sqrt_k = jnp.sqrt(k)
    alpha = jnp.maximum(y[..., 0:1] / sqrt_k, 1.0 + _EPS)
    coef = jnp.arccosh(alpha) / jnp.sqrt(alpha * alpha - 1.0)
    return jnp.where(_j_tmask(y.shape[-1]), 0.0, coef * y)


def _j_expmap(x, u, k):
    sqrt_k = jnp.sqrt(k)
    nomin = jnp.sqrt(jnp.maximum(_j_linner(u, u), 1e-8))
    theta = nomin / sqrt_k
    return jnp.cosh(theta) * x + sqrt_k * jnp.sinh(theta) * u / nomin


def _j_ptransp0(x, v, k):
    sqrt_k = jnp.sqrt(k)
    coef = _j_linner(x, v) / (k + sqrt_k * x[..., 0:1])
    return v + coef * jnp.where(_j_tmask(x.shape[-1]), x + sqrt_k, x)


def _j_mobius_add(a, b, k):
    return _j_expmap(a, _j_ptransp0(a, _j_logmap0(b, k), k), k)


# ------------------------------------ wrappers ------------------------------------

def prepare_mobius_linear_params(weight, bias, k, *, num_block=1, matmul_dtype=jnp.bfloat16):
    """One-time staging of the grid-invariant slabs (hoisted out of the per-forward path)."""
    out_p1, win = weight.shape
    assert win % num_block == 0
    d1 = win // num_block
    d = d1 - 1
    mm_dtype = jnp.float32 if matmul_dtype is None else matmul_dtype

    dp = pl.cdiv(d, 128) * 128             # contraction dim (time row dropped), lane padded
    op1p = pl.cdiv(out_p1, 128) * 128      # output dim (+ time lane), lane padded

    # Drop the dead time row of every per-block W^T (it multiplies x's identically-zero
    # time slot):  (out_p1, nb, d+1)[..., 1:] -> (nb, d, out_p1) -> zero pad -> matmul dtype.
    w3 = weight.astype(jnp.float32).reshape(out_p1, num_block, d1)[:, :, 1:]
    wT = jnp.transpose(w3, (1, 2, 0))
    wT = jnp.pad(wT, ((0, 0), (0, dp - d), (0, op1p - out_p1))).astype(mm_dtype)

    # Grid-invariant hyperbolic bias point expmap0(bias), computed once in plain JAX.
    bh = _j_expmap0(bias.astype(jnp.float32).reshape(1, out_p1), jnp.asarray(k, jnp.float32))
    bh = jnp.pad(bh, ((0, 0), (0, op1p - out_p1)))

    k2 = jnp.asarray(k, jnp.float32).reshape(1, 1)
    return dict(wT=wT, bias_h=bh, k=k2, num_block=num_block, d=d, out_dim=out_p1 - 1,
                dp=dp, op1p=op1p, mm_dtype=mm_dtype)


def mobius_linear_c_apply(x, params, *, tb=None, out_dtype=jnp.float32):
    """Forward of MobiusLinear_c (hyperbolic_input=False, hyperbolic_output=False, nonlin=None)."""
    B, in_dim = x.shape
    nb, d = params["num_block"], params["d"]
    dp, op1p, out_dim = params["dp"], params["op1p"], params["out_dim"]
    assert in_dim == nb * d, (in_dim, nb, d)

    # Batch tile: feed the MXU M dim (>=128 when the batch allows) but keep >=2 grid steps
    # on moderate batches so the v7x megacore can split the "parallel" axis.
    if tb is None:
        b8 = max(8, ((B + 7) // 8) * 8)
        if b8 < 256:
            tb = b8
        else:
            tb = min(512, max(128, ((b8 + 15) // 16) * 8))   # ~B/2, multiple of 8
    tb = max(8, ((int(tb) + 7) // 8) * 8)
    B_pad = pl.cdiv(B, tb) * tb

    # Per-forward glue: only x is re-laid-out (block-major, matmul dtype, zero padded).
    xd = jnp.transpose(x.reshape(B, nb, d), (1, 0, 2)).astype(params["mm_dtype"])
    xd = jnp.pad(xd, ((0, 0), (0, B_pad - B), (0, dp - d)))

    mm_item = np.dtype(params["mm_dtype"]).itemsize
    out_item = np.dtype(out_dtype).itemsize

    def build(single_buffer_consts):
        nbuf = 1 if single_buffer_consts else 2
        needed = (2 * nb * tb * dp * mm_item            # x tile, double-buffered
                  + nbuf * nb * dp * op1p * mm_item     # W^T slab (grid-invariant)
                  + nbuf * op1p * 4                     # bias point
                  + 2 * tb * op1p * out_item)           # output tile, double-buffered
        vmem_limit = min(int(needed * 1.5) + (4 << 20), 100 << 20)
        const_kw = {"pipeline_mode": pl.Buffered(1)} if single_buffer_consts else {}
        return pl.pallas_call(
            _mobius_linear_kernel,
            out_shape=jax.ShapeDtypeStruct((B_pad, op1p), out_dtype),
            grid_spec=pltpu.PrefetchScalarGridSpec(
                num_scalar_prefetch=0,
                grid=(B_pad // tb,),
                in_specs=[
                    pl.BlockSpec(memory_space=pltpu.MemorySpace.SMEM),             # k scalar
                    pl.BlockSpec((nb, tb, dp), lambda i: (0, i, 0)),               # x (block-major)
                    pl.BlockSpec((nb, dp, op1p), lambda i: (0, 0, 0), **const_kw),  # W^T
                    pl.BlockSpec((1, op1p), lambda i: (0, 0), **const_kw),          # expmap0(bias)
                ],
                out_specs=pl.BlockSpec((tb, op1p), lambda i: (i, 0)),              # lane-dense slab
            ),
            compiler_params=pltpu.CompilerParams(
                dimension_semantics=("parallel",),
                vmem_limit_bytes=vmem_limit,
            ),
        )

    args = (params["k"], xd, params["wT"], params["bias_h"])
    try:
        out_full = build(True)(*args)
    except Exception:
        # Fallback for jax builds that reject pl.Buffered(1) on a top-level pallas_call spec.
        out_full = build(False)(*args)

    # narrow(-1, 1, out_dim).sigmoid(): drop time lane, lane padding, and batch padding.
    return out_full[:B, 1:1 + out_dim]


def mobius_linear_c(x, weight, bias, k, *, num_block=1, tb=None,
                    matmul_dtype=jnp.bfloat16, out_dtype=jnp.float32):
    """Convenience one-shot wrapper (stages the weights on every call; prefer prepare+apply)."""
    params = prepare_mobius_linear_params(weight, bias, k, num_block=num_block,
                                          matmul_dtype=matmul_dtype)
    return mobius_linear_c_apply(x, params, tb=tb, out_dtype=out_dtype)


# ---------------------- pure-JAX reference (for the demo self-check) ----------------------

def _ref_mobius_linear(x, weight, bias, k, num_block):
    B, in_dim = x.shape
    d = in_dim // num_block
    w3 = weight.reshape(weight.shape[0], num_block, d + 1)
    xb = x.reshape(B, num_block, d)
    xb = jnp.concatenate([jnp.zeros((B, num_block, 1), x.dtype), xb], -1)
    p = _j_expmap0(xb, k)
    out = None
    for blk in range(num_block):
        mv = _j_expmap0(_j_logmap0(p[:, blk], k) @ w3[:, blk].T, k)
        out = mv if out is None else _j_mobius_add(out, mv, k)
    out = _j_mobius_add(out, _j_expmap0(bias[None, :], k), k)
    t = _j_logmap0(out, k)
    return jax.nn.sigmoid(t[:, 1:])


# ------------------------------------- demo -------------------------------------

if __name__ == "__main__":
    in_dim, out_dim, num_block = 32, 16, 2
    batch = 8

    key = jax.random.PRNGKey(0)
    kw, kb, kx = jax.random.split(key, 3)
    # deterministic parameter init matching the module's __init__ shapes
    weight = 0.01 * jax.random.normal(kw, (out_dim + 1, in_dim + num_block), jnp.float32)
    bias = jnp.concatenate(
        [jnp.zeros((1,), jnp.float32), 1e-4 * jax.random.normal(kb, (out_dim,), jnp.float32)])
    x = jax.random.normal(kx, (batch, in_dim), jnp.float32)
    k = jnp.float32(1.0)

    params = prepare_mobius_linear_params(weight, bias, k, num_block=num_block)  # staged once
    out = mobius_linear_c_apply(x, params)
    out = jax.block_until_ready(out)

    assert out.shape == (batch, out_dim), out.shape
    assert bool(jnp.isfinite(out).all()), "non-finite output"   # host-side isfinite check

    ref = _ref_mobius_linear(x, weight, bias, k, num_block)
    assert bool(jnp.allclose(out, ref, atol=2e-2, rtol=2e-2)), "kernel/reference mismatch"

    print("KERNEL_OK")
</pallas_src>

<mosaic_0001>
module attributes {stable_mosaic.version = 11 : i64} {
  func.func @_mobius_linear_kernel(%arg0: i32, %arg1: memref<1x1xf32, #tpu.memory_space<smem>>, %arg2: memref<2x8x128xbf16, #tpu.memory_space<vmem>>, %arg3: memref<2x128x128xbf16, #tpu.memory_space<vmem>>, %arg4: memref<1x128xf32, #tpu.memory_space<vmem>>, %arg5: memref<8x128xf32, #tpu.memory_space<vmem>>) attributes {dimension_semantics = [#tpu.dimension_semantics<parallel>], iteration_bounds = array<i64: 1>, scalar_prefetch = 0 : i64, scratch_operands = 0 : i64, tpu.core_type = #tpu.core_type<tc>, window_params = [{transform_indices = @transform_0, window_bounds = array<i64: 1, 1>}, {transform_indices = @transform_1, window_bounds = array<i64: 2, 8, 128>}, {pipeline_mode = #tpu.pipeline_mode<synchronous>, transform_indices = @transform_2, window_bounds = array<i64: 2, 128, 128>}, {pipeline_mode = #tpu.pipeline_mode<synchronous>, transform_indices = @transform_3, window_bounds = array<i64: 1, 128>}, {transform_indices = @transform_4, window_bounds = array<i64: 8, 128>}]} {
    %c0 = arith.constant 0 : index
    %c0_0 = arith.constant 0 : index
    %0 = memref.load %arg1[%c0, %c0_0] : memref<1x1xf32, #tpu.memory_space<smem>>
    %1 = math.sqrt %0 : f32
    %cst = arith.constant 1.000000e+00 : f32
    %2 = arith.divf %cst, %1 : f32
    %3 = tpu.iota {dimensions = array<i32: 1>} : vector<1x128xi32>
    %c0_i32 = arith.constant 0 : i32
    %4 = vector.broadcast %c0_i32 : i32 to vector<1x128xi32>
    %5 = arith.cmpi eq, %3, %4 : vector<1x128xi32>
    %c0_1 = arith.constant 0 : index
    %c0_2 = arith.constant 0 : index
    %c0_3 = arith.constant 0 : index
    %6 = vector.load %arg2[%c0_1, %c0_2, %c0_3] : memref<2x8x128xbf16, #tpu.memory_space<vmem>>, vector<1x8x128xbf16>
    %7 = vector.shape_cast %6 : vector<1x8x128xbf16> to vector<8x128xbf16>
    %c0_4 = arith.constant 0 : index
    %c0_5 = arith.constant 0 : index
    %c0_6 = arith.constant 0 : index
    %8 = vector.load %arg3[%c0_4, %c0_5, %c0_6] : memref<2x128x128xbf16, #tpu.memory_space<vmem>>, vector<1x128x128xbf16>
    %9 = vector.shape_cast %8 : vector<1x128x128xbf16> to vector<128x128xbf16>
    %cst_7 = arith.constant dense<0.000000e+00> : vector<8x128xf32>
    %10 = tpu.matmul %7, %9, %cst_7 {dimension_numbers = #tpu.dot_dimension_numbers<[1], [0], [0], [1], [0, 0, 1, 1], [], []>} : vector<8x128xbf16>, vector<128x128xbf16>, vector<8x128xf32> -> vector<8x128xf32>
    %11 = arith.mulf %10, %10 : vector<8x128xf32>
    %cst_8 = arith.constant dense<0.000000e+00> : vector<8xf32>
    %12 = vector.multi_reduction <add>, %11, %cst_8 [1] : vector<8x128xf32> to vector<8xf32>
    %13 = vector.shape_cast %12 : vector<8xf32> to vector<8x1xf32>
    %14 = vector.extract_strided_slice %11 {offsets = [0, 0], sizes = [8, 1], strides = [1, 1]} : vector<8x128xf32> to vector<8x1xf32>
    %cst_9 = arith.constant 2.000000e+00 : f32
    %15 = vector.broadcast %cst_9 : f32 to vector<8x1xf32>
    %16 = arith.mulf %15, %14 : vector<8x1xf32>
    %17 = arith.subf %13, %16 : vector<8x1xf32>
    %cst_10 = arith.constant 9.99999993E-9 : f32
    %18 = vector.broadcast %cst_10 : f32 to vector<8x1xf32>
    %19 = arith.maximumf %17, %18 : vector<8x1xf32>
    %20 = math.sqrt %19 : vector<8x1xf32>
    %21 = vector.broadcast %2 : f32 to vector<8x1xf32>
    %22 = arith.mulf %20, %21 : vector<8x1xf32>
    %23 = math.exp %22 : vector<8x1xf32>
    %cst_11 = arith.constant 0.000000e+00 : f32
    %24 = vector.broadcast %cst_11 : f32 to vector<8x1xf32>
    %25 = arith.subf %24, %22 : vector<8x1xf32>
    %26 = math.exp %25 : vector<8x1xf32>
    %27 = arith.addf %23, %26 : vector<8x1xf32>
    %cst_12 = arith.constant 5.000000e-01 : f32
    %28 = vector.broadcast %cst_12 : f32 to vector<8x1xf32>
    %29 = arith.mulf %28, %27 : vector<8x1xf32>
    %30 = arith.subf %23, %26 : vector<8x1xf32>
    %cst_13 = arith.constant 5.000000e-01 : f32
    %31 = vector.broadcast %cst_13 : f32 to vector<8x1xf32>
    %32 = arith.mulf %31, %30 : vector<8x1xf32>
    %33 = vector.broadcast %1 : f32 to vector<8x1xf32>
    %34 = arith.mulf %33, %32 : vector<8x1xf32>
    %35 = tpu.reciprocal %20 {approx = true} : vector<8x1xf32> -> vector<8x1xf32>
    %36 = arith.mulf %34, %35 : vector<8x1xf32>
    %37 = vector.broadcast %36 : vector<8x1xf32> to vector<8x128xf32>
    %38 = arith.mulf %37, %10 : vector<8x128xf32>
    %39 = vector.broadcast %1 : f32 to vector<8x1xf32>
    %40 = arith.mulf %29, %39 : vector<8x1xf32>
    %41 = vector.broadcast %40 : vector<8x1xf32> to vector<8x128xf32>
    %42 = arith.addf %38, %41 : vector<8x128xf32>
    %43 = vector.shape_cast %5 : vector<1x128xi1> to vector<1x128xi1>
    %44 = vector.broadcast %43 : vector<1x128xi1> to vector<8x128xi1>
    %45 = arith.select %44, %42, %38 : vector<8x128xi1>, vector<8x128xf32>
    %c1 = arith.constant 1 : index
    %c0_14 = arith.constant 0 : index
    %c0_15 = arith.constant 0 : index
    %46 = vector.load %arg2[%c1, %c0_14, %c0_15] : memref<2x8x128xbf16, #tpu.memory_space<vmem>>, vector<1x8x128xbf16>
    %47 = vector.shape_cast %46 : vector<1x8x128xbf16> to vector<8x128xbf16>
    %c1_16 = arith.constant 1 : index
    %c0_17 = arith.constant 0 : index
    %c0_18 = arith.constant 0 : index
    %48 = vector.load %arg3[%c1_16, %c0_17, %c0_18] : memref<2x128x128xbf16, #tpu.memory_space<vmem>>, vector<1x128x128xbf16>
    %49 = vector.shape_cast %48 : vector<1x128x128xbf16> to vector<128x128xbf16>
    %cst_19 = arith.constant dense<0.000000e+00> : vector<8x128xf32>
    %50 = tpu.matmul %47, %49, %cst_19 {dimension_numbers = #tpu.dot_dimension_numbers<[1], [0], [0], [1], [0, 0, 1, 1], [], []>} : vector<8x128xbf16>, vector<128x128xbf16>, vector<8x128xf32> -> vector<8x128xf32>
    %51 = arith.mulf %50, %50 : vector<8x128xf32>
    %cst_20 = arith.constant dense<0.000000e+00> : vector<8xf32>
    %52 = vector.multi_reduction <add>, %51, %cst_20 [1] : vector<8x128xf32> to vector<8xf32>
    %53 = vector.shape_cast %52 : vector<8xf32> to vector<8x1xf32>
    %54 = vector.extract_strided_slice %51 {offsets = [0, 0], sizes = [8, 1], strides = [1, 1]} : vector<8x128xf32> to vector<8x1xf32>
    %cst_21 = arith.constant 2.000000e+00 : f32
    %55 = vector.broadcast %cst_21 : f32 to vector<8x1xf32>
    %56 = arith.mulf %55, %54 : vector<8x1xf32>
    %57 = arith.subf %53, %56 : vector<8x1xf32>
    %cst_22 = arith.constant 9.99999993E-9 : f32
    %58 = vector.broadcast %cst_22 : f32 to vector<8x1xf32>
    %59 = arith.maximumf %57, %58 : vector<8x1xf32>
    %60 = math.sqrt %59 : vector<8x1xf32>
    %61 = vector.broadcast %2 : f32 to vector<8x1xf32>
    %62 = arith.mulf %60, %61 : vector<8x1xf32>
    %63 = math.exp %62 : vector<8x1xf32>
    %cst_23 = arith.constant 0.000000e+00 : f32
    %64 = vector.broadcast %cst_23 : f32 to vector<8x1xf32>
    %65 = arith.subf %64, %62 : vector<8x1xf32>
    %66 = math.exp %65 : vector<8x1xf32>
    %67 = arith.addf %63, %66 : vector<8x1xf32>
    %cst_24 = arith.constant 5.000000e-01 : f32
    %68 = vector.broadcast %cst_24 : f32 to vector<8x1xf32>
    %69 = arith.mulf %68, %67 : vector<8x1xf32>
    %70 = arith.subf %63, %66 : vector<8x1xf32>
    %cst_25 = arith.constant 5.000000e-01 : f32
    %71 = vector.broadcast %cst_25 : f32 to vector<8x1xf32>
    %72 = arith.mulf %71, %70 : vector<8x1xf32>
    %73 = vector.broadcast %1 : f32 to vector<8x1xf32>
    %74 = arith.mulf %73, %72 : vector<8x1xf32>
    %75 = tpu.reciprocal %60 {approx = true} : vector<8x1xf32> -> vector<8x1xf32>
    %76 = arith.mulf %74, %75 : vector<8x1xf32>
    %77 = vector.broadcast %76 : vector<8x1xf32> to vector<8x128xf32>
    %78 = arith.mulf %77, %50 : vector<8x128xf32>
    %79 = vector.broadcast %1 : f32 to vector<8x1xf32>
    %80 = arith.mulf %69, %79 : vector<8x1xf32>
    %81 = vector.broadcast %80 : vector<8x1xf32> to vector<8x128xf32>
    %82 = arith.addf %78, %81 : vector<8x128xf32>
    %83 = vector.shape_cast %5 : vector<1x128xi1> to vector<1x128xi1>
    %84 = vector.broadcast %83 : vector<1x128xi1> to vector<8x128xi1>
    %85 = arith.select %84, %82, %78 : vector<8x128xi1>, vector<8x128xf32>
    %86 = vector.extract_strided_slice %85 {offsets = [0, 0], sizes = [8, 1], strides = [1, 1]} : vector<8x128xf32> to vector<8x1xf32>
    %87 = vector.broadcast %2 : f32 to vector<8x1xf32>
    %88 = arith.mulf %86, %87 : vector<8x1xf32>
    %cst_26 = arith.constant 1.00000012 : f32
    %89 = vector.broadcast %cst_26 : f32 to vector<8x1xf32>
    %90 = arith.maximumf %88, %89 : vector<8x1xf32>
    %cst_27 = arith.constant 1.000000e+00 : f32
    %91 = vector.broadcast %cst_27 : f32 to vector<8x1xf32>
    %92 = arith.subf %90, %91 : vector<8x1xf32>
    %cst_28 = arith.constant 1.000000e+00 : f32
    %93 = vector.broadcast %cst_28 : f32 to vector<8x1xf32>
    %94 = arith.addf %90, %93 : vector<8x1xf32>
    %95 = arith.mulf %92, %94 : vector<8x1xf32>
    %96 = math.rsqrt %95 : vector<8x1xf32>
    %97 = arith.mulf %95, %96 : vector<8x1xf32>
    %98 = arith.addf %90, %97 : vector<8x1xf32>
    %99 = math.log %98 : vector<8x1xf32>
    %100 = arith.mulf %99, %96 : vector<8x1xf32>
    %101 = vector.broadcast %100 : vector<8x1xf32> to vector<8x128xf32>
    %102 = arith.mulf %101, %85 : vector<8x128xf32>
    %cst_29 = arith.constant 0.000000e+00 : f32
    %103 = vector.shape_cast %5 : vector<1x128xi1> to vector<1x128xi1>
    %104 = vector.broadcast %103 : vector<1x128xi1> to vector<8x128xi1>
    %105 = vector.broadcast %cst_29 : f32 to vector<8x128xf32>
    %106 = arith.select %104, %105, %102 : vector<8x128xi1>, vector<8x128xf32>
    %107 = arith.mulf %45, %106 : vector<8x128xf32>
    %cst_30 = arith.constant dense<0.000000e+00> : vector<8xf32>
    %108 = vector.multi_reduction <add>, %107, %cst_30 [1] : vector<8x128xf32> to vector<8xf32>
    %109 = vector.shape_cast %108 : vector<8xf32> to vector<8x1xf32>
    %110 = vector.extract_strided_slice %107 {offsets = [0, 0], sizes = [8, 1], strides = [1, 1]} : vector<8x128xf32> to vector<8x1xf32>
    %cst_31 = arith.constant 2.000000e+00 : f32
    %111 = vector.broadcast %cst_31 : f32 to vector<8x1xf32>
    %112 = arith.mulf %111, %110 : vector<8x1xf32>
    %113 = arith.subf %109, %112 : vector<8x1xf32>
    %114 = vector.extract_strided_slice %45 {offsets = [0, 0], sizes = [8, 1], strides = [1, 1]} : vector<8x128xf32> to vector<8x1xf32>
    %115 = vector.broadcast %1 : f32 to vector<8x1xf32>
    %116 = arith.mulf %115, %114 : vector<8x1xf32>
    %117 = vector.broadcast %0 : f32 to vector<8x1xf32>
    %118 = arith.addf %117, %116 : vector<8x1xf32>
    %119 = tpu.reciprocal %118 {approx = true} : vector<8x1xf32> -> vector<8x1xf32>
    %120 = arith.mulf %113, %119 : vector<8x1xf32>
    %121 = vector.broadcast %1 : f32 to vector<8x128xf32>
    %122 = arith.addf %45, %121 : vector<8x128xf32>
    %123 = vector.shape_cast %5 : vector<1x128xi1> to vector<1x128xi1>
    %124 = vector.broadcast %123 : vector<1x128xi1> to vector<8x128xi1>
    %125 = arith.select %124, %122, %45 : vector<8x128xi1>, vector<8x128xf32>
    %126 = vector.broadcast %120 : vector<8x1xf32> to vector<8x128xf32>
    %127 = arith.mulf %126, %125 : vector<8x128xf32>
    %128 = arith.addf %106, %127 : vector<8x128xf32>
    %129 = arith.mulf %128, %128 : vector<8x128xf32>
    %cst_32 = arith.constant dense<0.000000e+00> : vector<8xf32>
    %130 = vector.multi_reduction <add>, %129, %cst_32 [1] : vector<8x128xf32> to vector<8xf32>
    %131 = vector.shape_cast %130 : vector<8xf32> to vector<8x1xf32>
    %132 = vector.extract_strided_slice %129 {offsets = [0, 0], sizes = [8, 1], strides = [1, 1]} : vector<8x128xf32> to vector<8x1xf32>
    %cst_33 = arith.constant 2.000000e+00 : f32
    %133 = vector.broadcast %cst_33 : f32 to vector<8x1xf32>
    %134 = arith.mulf %133, %132 : vector<8x1xf32>
    %135 = arith.subf %131, %134 : vector<8x1xf32>
    %cst_34 = arith.constant 9.99999993E-9 : f32
    %136 = vector.broadcast %cst_34 : f32 to vector<8x1xf32>
    %137 = arith.maximumf %135, %136 : vector<8x1xf32>
    %138 = math.sqrt %137 : vector<8x1xf32>
    %139 = vector.broadcast %2 : f32 to vector<8x1xf32>
    %140 = arith.mulf %138, %139 : vector<8x1xf32>
    %141 = math.exp %140 : vector<8x1xf32>
    %cst_35 = arith.constant 0.000000e+00 : f32
    %142 = vector.broadcast %cst_35 : f32 to vector<8x1xf32>
    %143 = arith.subf %142, %140 : vector<8x1xf32>
    %144 = math.exp %143 : vector<8x1xf32>
    %145 = arith.addf %141, %144 : vector<8x1xf32>
    %cst_36 = arith.constant 5.000000e-01 : f32
    %146 = vector.broadcast %cst_36 : f32 to vector<8x1xf32>
    %147 = arith.mulf %146, %145 : vector<8x1xf32>
    %148 = arith.subf %141, %144 : vector<8x1xf32>
    %cst_37 = arith.constant 5.000000e-01 : f32
    %149 = vector.broadcast %cst_37 : f32 to vector<8x1xf32>
    %150 = arith.mulf %149, %148 : vector<8x1xf32>
    %151 = vector.broadcast %147 : vector<8x1xf32> to vector<8x128xf32>
    %152 = arith.mulf %151, %45 : vector<8x128xf32>
    %153 = vector.broadcast %1 : f32 to vector<8x1xf32>
    %154 = arith.mulf %153, %150 : vector<8x1xf32>
    %155 = tpu.reciprocal %138 {approx = true} : vector<8x1xf32> -> vector<8x1xf32>
    %156 = arith.mulf %154, %155 : vector<8x1xf32>
    %157 = vector.broadcast %156 : vector<8x1xf32> to vector<8x128xf32>
    %158 = arith.mulf %157, %128 : vector<8x128xf32>
    %159 = arith.addf %152, %158 : vector<8x128xf32>
    %c0_38 = arith.constant 0 : index
    %c0_39 = arith.constant 0 : index
    %160 = vector.load %arg4[%c0_38, %c0_39] : memref<1x128xf32, #tpu.memory_space<vmem>>, vector<1x128xf32>
    %161 = vector.extract_strided_slice %160 {offsets = [0, 0], sizes = [1, 1], strides = [1, 1]} : vector<1x128xf32> to vector<1x1xf32>
    %162 = vector.broadcast %2 : f32 to vector<1x1xf32>
    %163 = arith.mulf %161, %162 : vector<1x1xf32>
    %cst_40 = arith.constant 1.00000012 : f32
    %164 = vector.broadcast %cst_40 : f32 to vector<1x1xf32>
    %165 = arith.maximumf %163, %164 : vector<1x1xf32>
    %cst_41 = arith.constant 1.000000e+00 : f32
    %166 = vector.broadcast %cst_41 : f32 to vector<1x1xf32>
    %167 = arith.subf %165, %166 : vector<1x1xf32>
    %cst_42 = arith.constant 1.000000e+00 : f32
    %168 = vector.broadcast %cst_42 : f32 to vector<1x1xf32>
    %169 = arith.addf %165, %168 : vector<1x1xf32>
    %170 = arith.mulf %167, %169 : vector<1x1xf32>
    %171 = math.rsqrt %170 : vector<1x1xf32>
    %172 = arith.mulf %170, %171 : vector<1x1xf32>
    %173 = arith.addf %165, %172 : vector<1x1xf32>
    %174 = math.log %173 : vector<1x1xf32>
    %175 = arith.mulf %174, %171 : vector<1x1xf32>
    %176 = vector.broadcast %175 : vector<1x1xf32> to vector<1x128xf32>
    %177 = arith.mulf %176, %160 : vector<1x128xf32>
    %cst_43 = arith.constant 0.000000e+00 : f32
    %178 = vector.broadcast %cst_43 : f32 to vector<1x128xf32>
    %179 = arith.select %5, %178, %177 : vector<1x128xi1>, vector<1x128xf32>
    %180 = vector.broadcast %179 : vector<1x128xf32> to vector<8x128xf32>
    %181 = arith.mulf %159, %180 : vector<8x128xf32>
    %cst_44 = arith.constant dense<0.000000e+00> : vector<8xf32>
    %182 = vector.multi_reduction <add>, %181, %cst_44 [1] : vector<8x128xf32> to vector<8xf32>
    %183 = vector.shape_cast %182 : vector<8xf32> to vector<8x1xf32>
    %184 = vector.extract_strided_slice %181 {offsets = [0, 0], sizes = [8, 1], strides = [1, 1]} : vector<8x128xf32> to vector<8x1xf32>
    %cst_45 = arith.constant 2.000000e+00 : f32
    %185 = vector.broadcast %cst_45 : f32 to vector<8x1xf32>
    %186 = arith.mulf %185, %184 : vector<8x1xf32>
    %187 = arith.subf %183, %186 : vector<8x1xf32>
    %188 = vector.extract_strided_slice %159 {offsets = [0, 0], sizes = [8, 1], strides = [1, 1]} : vector<8x128xf32> to vector<8x1xf32>
    %189 = vector.broadcast %1 : f32 to vector<8x1xf32>
    %190 = arith.mulf %189, %188 : vector<8x1xf32>
    %191 = vector.broadcast %0 : f32 to vector<8x1xf32>
    %192 = arith.addf %191, %190 : vector<8x1xf32>
    %193 = tpu.reciprocal %192 {approx = true} : vector<8x1xf32> -> vector<8x1xf32>
    %194 = arith.mulf %187, %193 : vector<8x1xf32>
    %195 = vector.broadcast %1 : f32 to vector<8x128xf32>
    %196 = arith.addf %159, %195 : vector<8x128xf32>
    %197 = vector.shape_cast %5 : vector<1x128xi1> to vector<1x128xi1>
    %198 = vector.broadcast %197 : vector<1x128xi1> to vector<8x128xi1>
    %199 = arith.select %198, %196, %159 : vector<8x128xi1>, vector<8x128xf32>
    %200 = vector.broadcast %194 : vector<8x1xf32> to vector<8x128xf32>
    %201 = arith.mulf %200, %199 : vector<8x128xf32>
    %202 = vector.broadcast %179 : vector<1x128xf32> to vector<8x128xf32>
    %203 = arith.addf %202, %201 : vector<8x128xf32>
    %204 = arith.mulf %203, %203 : vector<8x128xf32>
    %cst_46 = arith.constant dense<0.000000e+00> : vector<8xf32>
    %205 = vector.multi_reduction <add>, %204, %cst_46 [1] : vector<8x128xf32> to vector<8xf32>
    %206 = vector.shape_cast %205 : vector<8xf32> to vector<8x1xf32>
    %207 = vector.extract_strided_slice %204 {offsets = [0, 0], sizes = [8, 1], strides = [1, 1]} : vector<8x128xf32> to vector<8x1xf32>
    %cst_47 = arith.constant 2.000000e+00 : f32
    %208 = vector.broadcast %cst_47 : f32 to vector<8x1xf32>
    %209 = arith.mulf %208, %207 : vector<8x1xf32>
    %210 = arith.subf %206, %209 : vector<8x1xf32>
    %cst_48 = arith.constant 9.99999993E-9 : f32
    %211 = vector.broadcast %cst_48 : f32 to vector<8x1xf32>
    %212 = arith.maximumf %210, %211 : vector<8x1xf32>
    %213 = math.sqrt %212 : vector<8x1xf32>
    %214 = vector.broadcast %2 : f32 to vector<8x1xf32>
    %215 = arith.mulf %213, %214 : vector<8x1xf32>
    %216 = math.exp %215 : vector<8x1xf32>
    %cst_49 = arith.constant 0.000000e+00 : f32
    %217 = vector.broadcast %cst_49 : f32 to vector<8x1xf32>
    %218 = arith.subf %217, %215 : vector<8x1xf32>
    %219 = math.exp %218 : vector<8x1xf32>
    %220 = arith.addf %216, %219 : vector<8x1xf32>
    %cst_50 = arith.constant 5.000000e-01 : f32
    %221 = vector.broadcast %cst_50 : f32 to vector<8x1xf32>
    %222 = arith.mulf %221, %220 : vector<8x1xf32>
    %223 = arith.subf %216, %219 : vector<8x1xf32>
    %cst_51 = arith.constant 5.000000e-01 : f32
    %224 = vector.broadcast %cst_51 : f32 to vector<8x1xf32>
    %225 = arith.mulf %224, %223 : vector<8x1xf32>
    %226 = vector.broadcast %222 : vector<8x1xf32> to vector<8x128xf32>
    %227 = arith.mulf %226, %159 : vector<8x128xf32>
    %228 = vector.broadcast %1 : f32 to vector<8x1xf32>
    %229 = arith.mulf %228, %225 : vector<8x1xf32>
    %230 = tpu.reciprocal %213 {approx = true} : vector<8x1xf32> -> vector<8x1xf32>
    %231 = arith.mulf %229, %230 : vector<8x1xf32>
    %232 = vector.broadcast %231 : vector<8x1xf32> to vector<8x128xf32>
    %233 = arith.mulf %232, %203 : vector<8x128xf32>
    %234 = arith.addf %227, %233 : vector<8x128xf32>
    %235 = vector.extract_strided_slice %234 {offsets = [0, 0], sizes = [8, 1], strides = [1, 1]} : vector<8x128xf32> to vector<8x1xf32>
    %236 = vector.broadcast %2 : f32 to vector<8x1xf32>
    %237 = arith.mulf %235, %236 : vector<8x1xf32>
    %cst_52 = arith.constant 1.00000012 : f32
    %238 = vector.broadcast %cst_52 : f32 to vector<8x1xf32>
    %239 = arith.maximumf %237, %238 : vector<8x1xf32>
    %cst_53 = arith.constant 1.000000e+00 : f32
    %240 = vector.broadcast %cst_53 : f32 to vector<8x1xf32>
    %241 = arith.subf %239, %240 : vector<8x1xf32>
    %cst_54 = arith.constant 1.000000e+00 : f32
    %242 = vector.broadcast %cst_54 : f32 to vector<8x1xf32>
    %243 = arith.addf %239, %242 : vector<8x1xf32>
    %244 = arith.mulf %241, %243 : vector<8x1xf32>
    %245 = math.rsqrt %244 : vector<8x1xf32>
    %246 = arith.mulf %244, %245 : vector<8x1xf32>
    %247 = arith.addf %239, %246 : vector<8x1xf32>
    %248 = math.log %247 : vector<8x1xf32>
    %249 = arith.mulf %248, %245 : vector<8x1xf32>
    %250 = vector.broadcast %249 : vector<8x1xf32> to vector<8x128xf32>
    %251 = arith.mulf %250, %234 : vector<8x128xf32>
    %cst_55 = arith.constant 0.000000e+00 : f32
    %252 = vector.shape_cast %5 : vector<1x128xi1> to vector<1x128xi1>
    %253 = vector.broadcast %252 : vector<1x128xi1> to vector<8x128xi1>
    %254 = vector.broadcast %cst_55 : f32 to vector<8x128xf32>
    %255 = arith.select %253, %254, %251 : vector<8x128xi1>, vector<8x128xf32>
    %cst_56 = arith.constant 5.000000e-01 : f32
    %256 = vector.broadcast %cst_56 : f32 to vector<8x128xf32>
    %257 = arith.mulf %256, %255 : vector<8x128xf32>
    %258 = math.tanh %257 : vector<8x128xf32>
    %cst_57 = arith.constant 5.000000e-01 : f32
    %259 = vector.broadcast %cst_57 : f32 to vector<8x128xf32>
    %260 = arith.mulf %259, %258 : vector<8x128xf32>
    %cst_58 = arith.constant 5.000000e-01 : f32
    %261 = vector.broadcast %cst_58 : f32 to vector<8x128xf32>
    %262 = arith.addf %260, %261 : vector<8x128xf32>
    %c0_59 = arith.constant 0 : index
    %c0_60 = arith.constant 0 : index
    %263 = vector.load %arg5[%c0_59, %c0_60] : memref<8x128xf32, #tpu.memory_space<vmem>>, vector<8x128xf32>
    tpu.vector_store %arg5[%c0_59, %c0_60], %262 {strides = array<i32>} : memref<8x128xf32, #tpu.memory_space<vmem>>, vector<8x128xf32>,
    return
  }
  func.func @transform_0(%arg0: i32) -> (i32, i32) {
    %c0_i32 = arith.constant 0 : i32
    %c0_i32_0 = arith.constant 0 : i32
    %c0_i32_1 = arith.constant 0 : i32
    return %c0_i32, %c0_i32_0 : i32, i32
  }
  func.func @transform_1(%arg0: i32) -> (i32, i32, i32) {
    %c0_i32 = arith.constant 0 : i32
    %c0_i32_0 = arith.constant 0 : i32
    %c0_i32_1 = arith.constant 0 : i32
    return %c0_i32, %arg0, %c0_i32_0 : i32, i32, i32
  }
  func.func @transform_2(%arg0: i32) -> (i32, i32, i32) {
    %c0_i32 = arith.constant 0 : i32
    %c0_i32_0 = arith.constant 0 : i32
    %c0_i32_1 = arith.constant 0 : i32
    %c0_i32_2 = arith.constant 0 : i32
    return %c0_i32, %c0_i32_0, %c0_i32_1 : i32, i32, i32
  }
  func.func @transform_3(%arg0: i32) -> (i32, i32) {
    %c0_i32 = arith.constant 0 : i32
    %c0_i32_0 = arith.constant 0 : i32
    %c0_i32_1 = arith.constant 0 : i32
    return %c0_i32, %c0_i32_0 : i32, i32
  }
  func.func @transform_4(%arg0: i32) -> (i32, i32) {
    %c0_i32 = arith.constant 0 : i32
    %c0_i32_0 = arith.constant 0 : i32
    return %arg0, %c0_i32 : i32, i32
  }
}

module attributes {stable_mosaic.version = 11 : i64} {
  func.func @_mobius_linear_kernel(%arg0: i32, %arg1: memref<1x1xf32, #tpu.memory_space<smem>>, %arg2: memref<2x8x128xbf16, #tpu.memory_space<vmem>>, %arg3: memref<2x128x128xbf16, #tpu.memory_space<vmem>>, %arg4: memref<1x128xf32, #tpu.memory_space<vmem>>, %arg5: memref<8x128xf32, #tpu.memory_space<vmem>>) attributes {dimension_semantics = [#tpu.dimension_semantics<parallel>], iteration_bounds = array<i64: 1>, scalar_prefetch = 0 : i64, scratch_operands = 0 : i64, tpu.core_type = #tpu.core_type<tc>, window_params = [{transform_indices = @transform_0, window_bounds = array<i64: 1, 1>}, {transform_indices = @transform_1, window_bounds = array<i64: 2, 8, 128>}, {pipeline_mode = #tpu.pipeline_mode<synchronous>, transform_indices = @transform_2, window_bounds = array<i64: 2, 128, 128>}, {pipeline_mode = #tpu.pipeline_mode<synchronous>, transform_indices = @transform_3, window_bounds = array<i64: 1, 128>}, {transform_indices = @transform_4, window_bounds = array<i64: 8, 128>}]} {
    %c0 = arith.constant 0 : index
    %c0_0 = arith.constant 0 : index
    %0 = memref.load %arg1[%c0, %c0_0] : memref<1x1xf32, #tpu.memory_space<smem>>
    %1 = math.sqrt %0 : f32
    %cst = arith.constant 1.000000e+00 : f32
    %2 = arith.divf %cst, %1 : f32
    %3 = tpu.iota {dimensions = array<i32: 1>} : vector<1x128xi32>
    %c0_i32 = arith.constant 0 : i32
    %4 = vector.broadcast %c0_i32 : i32 to vector<1x128xi32>
    %5 = arith.cmpi eq, %3, %4 : vector<1x128xi32>
    %c0_1 = arith.constant 0 : index
    %c0_2 = arith.constant 0 : index
    %c0_3 = arith.constant 0 : index
    %6 = vector.load %arg2[%c0_1, %c0_2, %c0_3] : memref<2x8x128xbf16, #tpu.memory_space<vmem>>, vector<1x8x128xbf16>
    %7 = vector.shape_cast %6 : vector<1x8x128xbf16> to vector<8x128xbf16>
    %c0_4 = arith.constant 0 : index
    %c0_5 = arith.constant 0 : index
    %c0_6 = arith.constant 0 : index
    %8 = vector.load %arg3[%c0_4, %c0_5, %c0_6] : memref<2x128x128xbf16, #tpu.memory_space<vmem>>, vector<1x128x128xbf16>
    %9 = vector.shape_cast %8 : vector<1x128x128xbf16> to vector<128x128xbf16>
    %cst_7 = arith.constant dense<0.000000e+00> : vector<8x128xf32>
    %10 = tpu.matmul %7, %9, %cst_7 {dimension_numbers = #tpu.dot_dimension_numbers<[1], [0], [0], [1], [0, 0, 1, 1], [], []>} : vector<8x128xbf16>, vector<128x128xbf16>, vector<8x128xf32> -> vector<8x128xf32>
    %11 = arith.mulf %10, %10 : vector<8x128xf32>
    %cst_8 = arith.constant dense<0.000000e+00> : vector<8xf32>
    %12 = vector.multi_reduction <add>, %11, %cst_8 [1] : vector<8x128xf32> to vector<8xf32>
    %13 = vector.shape_cast %12 : vector<8xf32> to vector<8x1xf32>
    %14 = vector.extract_strided_slice %11 {offsets = [0, 0], sizes = [8, 1], strides = [1, 1]} : vector<8x128xf32> to vector<8x1xf32>
    %cst_9 = arith.constant 2.000000e+00 : f32
    %15 = vector.broadcast %cst_9 : f32 to vector<8x1xf32>
    %16 = arith.mulf %15, %14 : vector<8x1xf32>
    %17 = arith.subf %13, %16 : vector<8x1xf32>
    %cst_10 = arith.constant 9.99999993E-9 : f32
    %18 = vector.broadcast %cst_10 : f32 to vector<8x1xf32>
    %19 = arith.maximumf %17, %18 : vector<8x1xf32>
    %20 = math.sqrt %19 : vector<8x1xf32>
    %21 = vector.broadcast %2 : f32 to vector<8x1xf32>
    %22 = arith.mulf %20, %21 : vector<8x1xf32>
    %23 = math.exp %22 : vector<8x1xf32>
    %cst_11 = arith.constant 0.000000e+00 : f32
    %24 = vector.broadcast %cst_11 : f32 to vector<8x1xf32>
    %25 = arith.subf %24, %22 : vector<8x1xf32>
    %26 = math.exp %25 : vector<8x1xf32>
    %27 = arith.addf %23, %26 : vector<8x1xf32>
    %cst_12 = arith.constant 5.000000e-01 : f32
    %28 = vector.broadcast %cst_12 : f32 to vector<8x1xf32>
    %29 = arith.mulf %28, %27 : vector<8x1xf32>
    %30 = arith.subf %23, %26 : vector<8x1xf32>
    %cst_13 = arith.constant 5.000000e-01 : f32
    %31 = vector.broadcast %cst_13 : f32 to vector<8x1xf32>
    %32 = arith.mulf %31, %30 : vector<8x1xf32>
    %33 = vector.broadcast %1 : f32 to vector<8x1xf32>
    %34 = arith.mulf %33, %32 : vector<8x1xf32>
    %35 = tpu.reciprocal %20 {approx = true} : vector<8x1xf32> -> vector<8x1xf32>
    %36 = arith.mulf %34, %35 : vector<8x1xf32>
    %37 = vector.broadcast %36 : vector<8x1xf32> to vector<8x128xf32>
    %38 = arith.mulf %37, %10 : vector<8x128xf32>
    %39 = vector.broadcast %1 : f32 to vector<8x1xf32>
    %40 = arith.mulf %29, %39 : vector<8x1xf32>
    %41 = vector.broadcast %40 : vector<8x1xf32> to vector<8x128xf32>
    %42 = arith.addf %38, %41 : vector<8x128xf32>
    %43 = vector.shape_cast %5 : vector<1x128xi1> to vector<1x128xi1>
    %44 = vector.broadcast %43 : vector<1x128xi1> to vector<8x128xi1>
    %45 = arith.select %44, %42, %38 : vector<8x128xi1>, vector<8x128xf32>
    %c1 = arith.constant 1 : index
    %c0_14 = arith.constant 0 : index
    %c0_15 = arith.constant 0 : index
    %46 = vector.load %arg2[%c1, %c0_14, %c0_15] : memref<2x8x128xbf16, #tpu.memory_space<vmem>>, vector<1x8x128xbf16>
    %47 = vector.shape_cast %46 : vector<1x8x128xbf16> to vector<8x128xbf16>
    %c1_16 = arith.constant 1 : index
    %c0_17 = arith.constant 0 : index
    %c0_18 = arith.constant 0 : index
    %48 = vector.load %arg3[%c1_16, %c0_17, %c0_18] : memref<2x128x128xbf16, #tpu.memory_space<vmem>>, vector<1x128x128xbf16>
    %49 = vector.shape_cast %48 : vector<1x128x128xbf16> to vector<128x128xbf16>
    %cst_19 = arith.constant dense<0.000000e+00> : vector<8x128xf32>
    %50 = tpu.matmul %47, %49, %cst_19 {dimension_numbers = #tpu.dot_dimension_numbers<[1], [0], [0], [1], [0, 0, 1, 1], [], []>} : vector<8x128xbf16>, vector<128x128xbf16>, vector<8x128xf32> -> vector<8x128xf32>
    %51 = arith.mulf %50, %50 : vector<8x128xf32>
    %cst_20 = arith.constant dense<0.000000e+00> : vector<8xf32>
    %52 = vector.multi_reduction <add>, %51, %cst_20 [1] : vector<8x128xf32> to vector<8xf32>
    %53 = vector.shape_cast %52 : vector<8xf32> to vector<8x1xf32>
    %54 = vector.extract_strided_slice %51 {offsets = [0, 0], sizes = [8, 1], strides = [1, 1]} : vector<8x128xf32> to vector<8x1xf32>
    %cst_21 = arith.constant 2.000000e+00 : f32
    %55 = vector.broadcast %cst_21 : f32 to vector<8x1xf32>
    %56 = arith.mulf %55, %54 : vector<8x1xf32>
    %57 = arith.subf %53, %56 : vector<8x1xf32>
    %cst_22 = arith.constant 9.99999993E-9 : f32
    %58 = vector.broadcast %cst_22 : f32 to vector<8x1xf32>
    %59 = arith.maximumf %57, %58 : vector<8x1xf32>
    %60 = math.sqrt %59 : vector<8x1xf32>
    %61 = vector.broadcast %2 : f32 to vector<8x1xf32>
    %62 = arith.mulf %60, %61 : vector<8x1xf32>
    %63 = math.exp %62 : vector<8x1xf32>
    %cst_23 = arith.constant 0.000000e+00 : f32
    %64 = vector.broadcast %cst_23 : f32 to vector<8x1xf32>
    %65 = arith.subf %64, %62 : vector<8x1xf32>
    %66 = math.exp %65 : vector<8x1xf32>
    %67 = arith.addf %63, %66 : vector<8x1xf32>
    %cst_24 = arith.constant 5.000000e-01 : f32
    %68 = vector.broadcast %cst_24 : f32 to vector<8x1xf32>
    %69 = arith.mulf %68, %67 : vector<8x1xf32>
    %70 = arith.subf %63, %66 : vector<8x1xf32>
    %cst_25 = arith.constant 5.000000e-01 : f32
    %71 = vector.broadcast %cst_25 : f32 to vector<8x1xf32>
    %72 = arith.mulf %71, %70 : vector<8x1xf32>
    %73 = vector.broadcast %1 : f32 to vector<8x1xf32>
    %74 = arith.mulf %73, %72 : vector<8x1xf32>
    %75 = tpu.reciprocal %60 {approx = true} : vector<8x1xf32> -> vector<8x1xf32>
    %76 = arith.mulf %74, %75 : vector<8x1xf32>
    %77 = vector.broadcast %76 : vector<8x1xf32> to vector<8x128xf32>
    %78 = arith.mulf %77, %50 : vector<8x128xf32>
    %79 = vector.broadcast %1 : f32 to vector<8x1xf32>
    %80 = arith.mulf %69, %79 : vector<8x1xf32>
    %81 = vector.broadcast %80 : vector<8x1xf32> to vector<8x128xf32>
    %82 = arith.addf %78, %81 : vector<8x128xf32>
    %83 = vector.shape_cast %5 : vector<1x128xi1> to vector<1x128xi1>
    %84 = vector.broadcast %83 : vector<1x128xi1> to vector<8x128xi1>
    %85 = arith.select %84, %82, %78 : vector<8x128xi1>, vector<8x128xf32>
    %86 = vector.extract_strided_slice %85 {offsets = [0, 0], sizes = [8, 1], strides = [1, 1]} : vector<8x128xf32> to vector<8x1xf32>
    %87 = vector.broadcast %2 : f32 to vector<8x1xf32>
    %88 = arith.mulf %86, %87 : vector<8x1xf32>
    %cst_26 = arith.constant 1.00000012 : f32
    %89 = vector.broadcast %cst_26 : f32 to vector<8x1xf32>
    %90 = arith.maximumf %88, %89 : vector<8x1xf32>
    %cst_27 = arith.constant 1.000000e+00 : f32
    %91 = vector.broadcast %cst_27 : f32 to vector<8x1xf32>
    %92 = arith.subf %90, %91 : vector<8x1xf32>
    %cst_28 = arith.constant 1.000000e+00 : f32
    %93 = vector.broadcast %cst_28 : f32 to vector<8x1xf32>
    %94 = arith.addf %90, %93 : vector<8x1xf32>
    %95 = arith.mulf %92, %94 : vector<8x1xf32>
    %96 = math.rsqrt %95 : vector<8x1xf32>
    %97 = arith.mulf %95, %96 : vector<8x1xf32>
    %98 = arith.addf %90, %97 : vector<8x1xf32>
    %99 = math.log %98 : vector<8x1xf32>
    %100 = arith.mulf %99, %96 : vector<8x1xf32>
    %101 = vector.broadcast %100 : vector<8x1xf32> to vector<8x128xf32>
    %102 = arith.mulf %101, %85 : vector<8x128xf32>
    %cst_29 = arith.constant 0.000000e+00 : f32
    %103 = vector.shape_cast %5 : vector<1x128xi1> to vector<1x128xi1>
    %104 = vector.broadcast %103 : vector<1x128xi1> to vector<8x128xi1>
    %105 = vector.broadcast %cst_29 : f32 to vector<8x128xf32>
    %106 = arith.select %104, %105, %102 : vector<8x128xi1>, vector<8x128xf32>
    %107 = arith.mulf %45, %106 : vector<8x128xf32>
    %cst_30 = arith.constant dense<0.000000e+00> : vector<8xf32>
    %108 = vector.multi_reduction <add>, %107, %cst_30 [1] : vector<8x128xf32> to vector<8xf32>
    %109 = vector.shape_cast %108 : vector<8xf32> to vector<8x1xf32>
    %110 = vector.extract_strided_slice %107 {offsets = [0, 0], sizes = [8, 1], strides = [1, 1]} : vector<8x128xf32> to vector<8x1xf32>
    %cst_31 = arith.constant 2.000000e+00 : f32
    %111 = vector.broadcast %cst_31 : f32 to vector<8x1xf32>
    %112 = arith.mulf %111, %110 : vector<8x1xf32>
    %113 = arith.subf %109, %112 : vector<8x1xf32>
    %114 = vector.extract_strided_slice %45 {offsets = [0, 0], sizes = [8, 1], strides = [1, 1]} : vector<8x128xf32> to vector<8x1xf32>
    %115 = vector.broadcast %1 : f32 to vector<8x1xf32>
    %116 = arith.mulf %115, %114 : vector<8x1xf32>
    %117 = vector.broadcast %0 : f32 to vector<8x1xf32>
    %118 = arith.addf %117, %116 : vector<8x1xf32>
    %119 = tpu.reciprocal %118 {approx = true} : vector<8x1xf32> -> vector<8x1xf32>
    %120 = arith.mulf %113, %119 : vector<8x1xf32>
    %121 = vector.broadcast %1 : f32 to vector<8x128xf32>
    %122 = arith.addf %45, %121 : vector<8x128xf32>
    %123 = vector.shape_cast %5 : vector<1x128xi1> to vector<1x128xi1>
    %124 = vector.broadcast %123 : vector<1x128xi1> to vector<8x128xi1>
    %125 = arith.select %124, %122, %45 : vector<8x128xi1>, vector<8x128xf32>
    %126 = vector.broadcast %120 : vector<8x1xf32> to vector<8x128xf32>
    %127 = arith.mulf %126, %125 : vector<8x128xf32>
    %128 = arith.addf %106, %127 : vector<8x128xf32>
    %129 = arith.mulf %128, %128 : vector<8x128xf32>
    %cst_32 = arith.constant dense<0.000000e+00> : vector<8xf32>
    %130 = vector.multi_reduction <add>, %129, %cst_32 [1] : vector<8x128xf32> to vector<8xf32>
    %131 = vector.shape_cast %130 : vector<8xf32> to vector<8x1xf32>
    %132 = vector.extract_strided_slice %129 {offsets = [0, 0], sizes = [8, 1], strides = [1, 1]} : vector<8x128xf32> to vector<8x1xf32>
    %cst_33 = arith.constant 2.000000e+00 : f32
    %133 = vector.broadcast %cst_33 : f32 to vector<8x1xf32>
    %134 = arith.mulf %133, %132 : vector<8x1xf32>
    %135 = arith.subf %131, %134 : vector<8x1xf32>
    %cst_34 = arith.constant 9.99999993E-9 : f32
    %136 = vector.broadcast %cst_34 : f32 to vector<8x1xf32>
    %137 = arith.maximumf %135, %136 : vector<8x1xf32>
    %138 = math.sqrt %137 : vector<8x1xf32>
    %139 = vector.broadcast %2 : f32 to vector<8x1xf32>
    %140 = arith.mulf %138, %139 : vector<8x1xf32>
    %141 = math.exp %140 : vector<8x1xf32>
    %cst_35 = arith.constant 0.000000e+00 : f32
    %142 = vector.broadcast %cst_35 : f32 to vector<8x1xf32>
    %143 = arith.subf %142, %140 : vector<8x1xf32>
    %144 = math.exp %143 : vector<8x1xf32>
    %145 = arith.addf %141, %144 : vector<8x1xf32>
    %cst_36 = arith.constant 5.000000e-01 : f32
    %146 = vector.broadcast %cst_36 : f32 to vector<8x1xf32>
    %147 = arith.mulf %146, %145 : vector<8x1xf32>
    %148 = arith.subf %141, %144 : vector<8x1xf32>
    %cst_37 = arith.constant 5.000000e-01 : f32
    %149 = vector.broadcast %cst_37 : f32 to vector<8x1xf32>
    %150 = arith.mulf %149, %148 : vector<8x1xf32>
    %151 = vector.broadcast %147 : vector<8x1xf32> to vector<8x128xf32>
    %152 = arith.mulf %151, %45 : vector<8x128xf32>
    %153 = vector.broadcast %1 : f32 to vector<8x1xf32>
    %154 = arith.mulf %153, %150 : vector<8x1xf32>
    %155 = tpu.reciprocal %138 {approx = true} : vector<8x1xf32> -> vector<8x1xf32>
    %156 = arith.mulf %154, %155 : vector<8x1xf32>
    %157 = vector.broadcast %156 : vector<8x1xf32> to vector<8x128xf32>
    %158 = arith.mulf %157, %128 : vector<8x128xf32>
    %159 = arith.addf %152, %158 : vector<8x128xf32>
    %c0_38 = arith.constant 0 : index
    %c0_39 = arith.constant 0 : index
    %160 = vector.load %arg4[%c0_38, %c0_39] : memref<1x128xf32, #tpu.memory_space<vmem>>, vector<1x128xf32>
    %161 = vector.extract_strided_slice %160 {offsets = [0, 0], sizes = [1, 1], strides = [1, 1]} : vector<1x128xf32> to vector<1x1xf32>
    %162 = vector.broadcast %2 : f32 to vector<1x1xf32>
    %163 = arith.mulf %161, %162 : vector<1x1xf32>
    %cst_40 = arith.constant 1.00000012 : f32
    %164 = vector.broadcast %cst_40 : f32 to vector<1x1xf32>
    %165 = arith.maximumf %163, %164 : vector<1x1xf32>
    %cst_41 = arith.constant 1.000000e+00 : f32
    %166 = vector.broadcast %cst_41 : f32 to vector<1x1xf32>
    %167 = arith.subf %165, %166 : vector<1x1xf32>
    %cst_42 = arith.constant 1.000000e+00 : f32
    %168 = vector.broadcast %cst_42 : f32 to vector<1x1xf32>
    %169 = arith.addf %165, %168 : vector<1x1xf32>
    %170 = arith.mulf %167, %169 : vector<1x1xf32>
    %171 = math.rsqrt %170 : vector<1x1xf32>
    %172 = arith.mulf %170, %171 : vector<1x1xf32>
    %173 = arith.addf %165, %172 : vector<1x1xf32>
    %174 = math.log %173 : vector<1x1xf32>
    %175 = arith.mulf %174, %171 : vector<1x1xf32>
    %176 = vector.broadcast %175 : vector<1x1xf32> to vector<1x128xf32>
    %177 = arith.mulf %176, %160 : vector<1x128xf32>
    %cst_43 = arith.constant 0.000000e+00 : f32
    %178 = vector.broadcast %cst_43 : f32 to vector<1x128xf32>
    %179 = arith.select %5, %178, %177 : vector<1x128xi1>, vector<1x128xf32>
    %180 = vector.broadcast %179 : vector<1x128xf32> to vector<8x128xf32>
    %181 = arith.mulf %159, %180 : vector<8x128xf32>
    %cst_44 = arith.constant dense<0.000000e+00> : vector<8xf32>
    %182 = vector.multi_reduction <add>, %181, %cst_44 [1] : vector<8x128xf32> to vector<8xf32>
    %183 = vector.shape_cast %182 : vector<8xf32> to vector<8x1xf32>
    %184 = vector.extract_strided_slice %181 {offsets = [0, 0], sizes = [8, 1], strides = [1, 1]} : vector<8x128xf32> to vector<8x1xf32>
    %cst_45 = arith.constant 2.000000e+00 : f32
    %185 = vector.broadcast %cst_45 : f32 to vector<8x1xf32>
    %186 = arith.mulf %185, %184 : vector<8x1xf32>
    %187 = arith.subf %183, %186 : vector<8x1xf32>
    %188 = vector.extract_strided_slice %159 {offsets = [0, 0], sizes = [8, 1], strides = [1, 1]} : vector<8x128xf32> to vector<8x1xf32>
    %189 = vector.broadcast %1 : f32 to vector<8x1xf32>
    %190 = arith.mulf %189, %188 : vector<8x1xf32>
    %191 = vector.broadcast %0 : f32 to vector<8x1xf32>
    %192 = arith.addf %191, %190 : vector<8x1xf32>
    %193 = tpu.reciprocal %192 {approx = true} : vector<8x1xf32> -> vector<8x1xf32>
    %194 = arith.mulf %187, %193 : vector<8x1xf32>
    %195 = vector.broadcast %1 : f32 to vector<8x128xf32>
    %196 = arith.addf %159, %195 : vector<8x128xf32>
    %197 = vector.shape_cast %5 : vector<1x128xi1> to vector<1x128xi1>
    %198 = vector.broadcast %197 : vector<1x128xi1> to vector<8x128xi1>
    %199 = arith.select %198, %196, %159 : vector<8x128xi1>, vector<8x128xf32>
    %200 = vector.broadcast %194 : vector<8x1xf32> to vector<8x128xf32>
    %201 = arith.mulf %200, %199 : vector<8x128xf32>
    %202 = vector.broadcast %179 : vector<1x128xf32> to vector<8x128xf32>
    %203 = arith.addf %202, %201 : vector<8x128xf32>
    %204 = arith.mulf %203, %203 : vector<8x128xf32>
    %cst_46 = arith.constant dense<0.000000e+00> : vector<8xf32>
    %205 = vector.multi_reduction <add>, %204, %cst_46 [1] : vector<8x128xf32> to vector<8xf32>
    %206 = vector.shape_cast %205 : vector<8xf32> to vector<8x1xf32>
    %207 = vector.extract_strided_slice %204 {offsets = [0, 0], sizes = [8, 1], strides = [1, 1]} : vector<8x128xf32> to vector<8x1xf32>
    %cst_47 = arith.constant 2.000000e+00 : f32
    %208 = vector.broadcast %cst_47 : f32 to vector<8x1xf32>
    %209 = arith.mulf %208, %207 : vector<8x1xf32>
    %210 = arith.subf %206, %209 : vector<8x1xf32>
    %cst_48 = arith.constant 9.99999993E-9 : f32
    %211 = vector.broadcast %cst_48 : f32 to vector<8x1xf32>
    %212 = arith.maximumf %210, %211 : vector<8x1xf32>
    %213 = math.sqrt %212 : vector<8x1xf32>
    %214 = vector.broadcast %2 : f32 to vector<8x1xf32>
    %215 = arith.mulf %213, %214 : vector<8x1xf32>
    %216 = math.exp %215 : vector<8x1xf32>
    %cst_49 = arith.constant 0.000000e+00 : f32
    %217 = vector.broadcast %cst_49 : f32 to vector<8x1xf32>
    %218 = arith.subf %217, %215 : vector<8x1xf32>
    %219 = math.exp %218 : vector<8x1xf32>
    %220 = arith.addf %216, %219 : vector<8x1xf32>
    %cst_50 = arith.constant 5.000000e-01 : f32
    %221 = vector.broadcast %cst_50 : f32 to vector<8x1xf32>
    %222 = arith.mulf %221, %220 : vector<8x1xf32>
    %223 = arith.subf %216, %219 : vector<8x1xf32>
    %cst_51 = arith.constant 5.000000e-01 : f32
    %224 = vector.broadcast %cst_51 : f32 to vector<8x1xf32>
    %225 = arith.mulf %224, %223 : vector<8x1xf32>
    %226 = vector.broadcast %222 : vector<8x1xf32> to vector<8x128xf32>
    %227 = arith.mulf %226, %159 : vector<8x128xf32>
    %228 = vector.broadcast %1 : f32 to vector<8x1xf32>
    %229 = arith.mulf %228, %225 : vector<8x1xf32>
    %230 = tpu.reciprocal %213 {approx = true} : vector<8x1xf32> -> vector<8x1xf32>
    %231 = arith.mulf %229, %230 : vector<8x1xf32>
    %232 = vector.broadcast %231 : vector<8x1xf32> to vector<8x128xf32>
    %233 = arith.mulf %232, %203 : vector<8x128xf32>
    %234 = arith.addf %227, %233 : vector<8x128xf32>
    %235 = vector.extract_strided_slice %234 {offsets = [0, 0], sizes = [8, 1], strides = [1, 1]} : vector<8x128xf32> to vector<8x1xf32>
    %236 = vector.broadcast %2 : f32 to vector<8x1xf32>
    %237 = arith.mulf %235, %236 : vector<8x1xf32>
    %cst_52 = arith.constant 1.00000012 : f32
    %238 = vector.broadcast %cst_52 : f32 to vector<8x1xf32>
    %239 = arith.maximumf %237, %238 : vector<8x1xf32>
    %cst_53 = arith.constant 1.000000e+00 : f32
    %240 = vector.broadcast %cst_53 : f32 to vector<8x1xf32>
    %241 = arith.subf %239, %240 : vector<8x1xf32>
    %cst_54 = arith.constant 1.000000e+00 : f32
    %242 = vector.broadcast %cst_54 : f32 to vector<8x1xf32>
    %243 = arith.addf %239, %242 : vector<8x1xf32>
    %244 = arith.mulf %241, %243 : vector<8x1xf32>
    %245 = math.rsqrt %244 : vector<8x1xf32>
    %246 = arith.mulf %244, %245 : vector<8x1xf32>
    %247 = arith.addf %239, %246 : vector<8x1xf32>
    %248 = math.log %247 : vector<8x1xf32>
    %249 = arith.mulf %248, %245 : vector<8x1xf32>
    %250 = vector.broadcast %249 : vector<8x1xf32> to vector<8x128xf32>
    %251 = arith.mulf %250, %234 : vector<8x128xf32>
    %cst_55 = arith.constant 0.000000e+00 : f32
    %252 = vector.shape_cast %5 : vector<1x128xi1> to vector<1x128xi1>
    %253 = vector.broadcast %252 : vector<1x128xi1> to vector<8x128xi1>
    %254 = vector.broadcast %cst_55 : f32 to vector<8x128xf32>
    %255 = arith.select %253, %254, %251 : vector<8x128xi1>, vector<8x128xf32>
    %cst_56 = arith.constant 5.000000e-01 : f32
    %256 = vector.broadcast %cst_56 : f32 to vector<8x128xf32>
    %257 = arith.mulf %256, %255 : vector<8x128xf32>
    %258 = math.tanh %257 : vector<8x128xf32>
    %cst_57 = arith.constant 5.000000e-01 : f32
    %259 = vector.broadcast %cst_57 : f32 to vector<8x128xf32>
    %260 = arith.mulf %259, %258 : vector<8x128xf32>
    %cst_58 = arith.constant 5.000000e-01 : f32
    %261 = vector.broadcast %cst_58 : f32 to vector<8x128xf32>
    %262 = arith.addf %260, %261 : vector<8x128xf32>
    %c0_59 = arith.constant 0 : index
    %c0_60 = arith.constant 0 : index
    %263 = vector.load %arg5[%c0_59, %c0_60] : memref<8x128xf32, #tpu.memory_space<vmem>>, vector<8x128xf32>
    tpu.vector_store %arg5[%c0_59, %c0_60], %262 {strides = array<i32>} : memref<8x128xf32, #tpu.memory_space<vmem>>, vector<8x128xf32>,
    return
  }
  func.func @transform_0(%arg0: i32) -> (i32, i32) {
    %c0_i32 = arith.constant 0 : i32
    %c0_i32_0 = arith.constant 0 : i32
    %c0_i32_1 = arith.constant 0 : i32
    return %c0_i32, %c0_i32_0 : i32, i32
  }
  func.func @transform_1(%arg0: i32) -> (i32, i32, i32) {
    %c0_i32 = arith.constant 0 : i32
    %c0_i32_0 = arith.constant 0 : i32
    %c0_i32_1 = arith.constant 0 : i32
    return %c0_i32, %arg0, %c0_i32_0 : i32, i32, i32
  }
  func.func @transform_2(%arg0: i32) -> (i32, i32, i32) {
    %c0_i32 = arith.constant 0 : i32
    %c0_i32_0 = arith.constant 0 : i32
    %c0_i32_1 = arith.constant 0 : i32
    %c0_i32_2 = arith.constant 0 : i32
    return %c0_i32, %c0_i32_0, %c0_i32_1 : i32, i32, i32
  }
  func.func @transform_3(%arg0: i32) -> (i32, i32) {
    %c0_i32 = arith.constant 0 : i32
    %c0_i32_0 = arith.constant 0 : i32
    %c0_i32_1 = arith.constant 0 : i32
    return %c0_i32, %c0_i32_0 : i32, i32
  }
  func.func @transform_4(%arg0: i32) -> (i32, i32) {
    %c0_i32 = arith.constant 0 : i32
    %c0_i32_0 = arith.constant 0 : i32
    return %arg0, %c0_i32 : i32, i32
  }
}

</mosaic_0001>

<bundles_post_ra>
// kernel: tpu_custom_call.1
= control target key start
LH: loop header
LB: loop body
LE: loop exit
PB: predicated region body
PF: predicated region fallthrough
CT: control target
= control target key end

     0   :  { %10 = vsyncpa [#allocation4], 0  ;;  %s938_s0 = inlined_call_operand.<no memory space> [shape: f32[1,1], index: 0, kind: input, shape index: {}]   ;;  %s939_s1 = inlined_call_operand.hbm [shape: bf16[2,8,128], index: 1, kind: input, shape index: {}]   ;;  %s940_s2 = inlined_call_operand.hbm [shape: bf16[2,128,128], index: 2, kind: input, shape index: {}]   ;;  %s941_s3 = inlined_call_operand.vmem [shape: f32[1,128], index: 3, kind: input, shape index: {}]   ;;  %s942_s4 = inlined_call_operand.hbm [shape: f32[8,128], index: 4, kind: output, shape index: {}]  }
   0x1   :  { %11 = vsyncpa [#allocation7], 0 }
   0x2   :  { %12 = vsyncpa [#allocation5], 0  ;;  %s792_s15 = smov [#allocation3]   ;;  %s720_s19 = scalar_lea.hbm %s939_s1, 128 }
   0x3   :  { %s20_s16 = sshll.u32 %s792_s15, 4  ;;  %p721_p0 = scmp.ne.s32.totalorder %s939_s1, %s720_s19  ;;  %s21_s16 = int_to_ptr.vmem [resolvable:$true] %s20_s16 }
   0x4   :  { %p724_p1 = scmp.lt.u32.totalorder %s720_s19, %s939_s1 }
   0x6   :  { %p726_p2 = pnand %p724_p1, %p721_p0 }
   0x8   :  { %729 = shalt.err (!%p726_p2)
}
   0x9   :  { %s730_s24 = scalar_lea.vmem %s21_s16, 128  ;;  %p735_p4 = scmp.lt.s32.totalorder %s21_s16, %s21_s16 }
   0xa   :  { %p731_p3 = scmp.ne.s32.totalorder %s21_s16, %s730_s24  ;;  %p736_p5 = scmp.lt.s32.totalorder %s730_s24, %s730_s24 }
   0xc   :  { %p737_p6 = por %p736_p5, %p735_p4 }
   0xe   :  { %p738_p7 = pnand %p737_p6, %p731_p3 }
  0x10   :  { %741 = shalt.err (!%p738_p7)
}
  0x11   :  { %s793_s25 = smov 64   ;;  %s794_s26 = smov 4  }
  0x12   :  { %26 = dma.hbm_to_vmem [thread:$0]  %s939_s1, 128, %s21_s16, [#allocation4], %s793_s25, %s793_s25, %s794_s26  }
  0x13   :  { %s795_s29 = smov [#allocation6]   ;;  %s742_s7 = scalar_lea.hbm %s940_s2, 2048 }
  0x14   :  { %s32_s30 = sshll.u32 %s795_s29, 4  ;;  %p743_p8 = scmp.ne.s32.totalorder %s940_s2, %s742_s7  ;;  %s33_s30 = int_to_ptr.vmem [resolvable:$true] %s32_s30 }
  0x15   :  { %p746_p9 = scmp.lt.u32.totalorder %s742_s7, %s940_s2 }
  0x17   :  { %p748_p10 = pnand %p746_p9, %p743_p8 }
  0x19   :  { %751 = shalt.err (!%p748_p10)
}
  0x1a   :  { %s752_s12 = scalar_lea.vmem %s33_s30, 2048  ;;  %p757_p12 = scmp.lt.s32.totalorder %s33_s30, %s33_s30 }
  0x1b   :  { %p753_p11 = scmp.ne.s32.totalorder %s33_s30, %s752_s12  ;;  %p758_p13 = scmp.lt.s32.totalorder %s752_s12, %s752_s12 }
  0x1d   :  { %p759_p0 = por %p758_p13, %p757_p12 }
  0x1f   :  { %p760_p1 = pnand %p759_p0, %p753_p11 }
  0x21   :  { %763 = shalt.err (!%p760_p1)
}
  0x22   :  { %38 = dma.hbm_to_vmem [thread:$0]  %s940_s2, 2048, %s33_s30, [#allocation7], %s793_s25, %s793_s25, %s794_s26  }
  0x23   :  { %786 = dma.done.wait [#allocation4], 128  }
  0x24   :  { %787 = vsyncadd [#allocation4], 4294967168 }
  0x25   :  { %788 = dma.done.wait [#allocation7], 2048  }
  0x26   :  { %789 = vsyncadd [#allocation7], 4294965248  ;;  %v796_v0 = vmov 0.0   ;;  %vm797_vm0 = vmmov 0   ;;  %v650_v1 = vld [vmem:[#allocation6 + $0x40] sm:$0xff]   ;;  %v652_v3 = vld [vmem:[#allocation6 + $0x48] sm:$0xff]   ;;  %v852_v19 = vstv %s938_s0 }
  0x27   :  { %616 = vmatprep.subr.bf16.mxu1 %v796_v0  ;;  %596 = vmatprep.subr.bf16.mxu0 %v796_v0  ;;  %v651_v2 = vld [vmem:[#allocation6] sm:$0xff]   ;;  %v653_v4 = vld [vmem:[#allocation6 + $0x8] sm:$0xff]   ;;  %v654_v5 = vld [vmem:[#allocation6 + $0x50] sm:$0xff]   ;;  %666 = vrsqrt.f32 %v852_v19  ;;  %vm52_vm1 = vcmp.eq.f32.partialorder %v852_v19, inf  ;;  %v55_v21 = vand.u32 2147483648, %v852_v19  ;;  %vm54_vm2 = vcmp.eq.f32.partialorder %v852_v19, 0.0 }
  0x28   :  { %632 = vmatprep.mubr.msk.bf16.mxu1 %vm797_vm0, %v796_v0  ;;  %612 = vmatprep.mubr.msk.bf16.mxu0 %vm797_vm0, %v796_v0  ;;  %v655_v6 = vld [vmem:[#allocation6 + $0x10] sm:$0xff]   ;;  %v656_v7 = vld [vmem:[#allocation6 + $0x58] sm:$0xff]   ;;  %v658_v9 = vld [vmem:[#allocation6 + $0x60] sm:$0xff]   ;;  %v798_v37 = vmov 0  }
  0x29   :  { %617 = vmatpush3.bf16.msra.mxu1 %v650_v1  ;;  %597 = vmatpush3.bf16.msra.mxu0 %v651_v2  ;;  %v657_v8 = vld [vmem:[#allocation6 + $0x18] sm:$0xff]   ;;  %v659_v10 = vld [vmem:[#allocation6 + $0x20] sm:$0xff]   ;;  %v660_v11 = vld [vmem:[#allocation6 + $0x68] sm:$0xff]  }
  0x2a   :  { %618 = vmatprep.subr.bf16.mxu1 %v796_v0  ;;  %598 = vmatprep.subr.bf16.mxu0 %v796_v0  ;;  %v661_v12 = vld [vmem:[#allocation6 + $0x28] sm:$0xff]   ;;  %v662_v13 = vld [vmem:[#allocation6 + $0x70] sm:$0xff]   ;;  %v664_v15 = vld [vmem:[#allocation6 + $0x78] sm:$0xff]  }
  0x2b   :  { %v663_v14 = vld [vmem:[#allocation6 + $0x30] sm:$0xff]   ;;  %v665_v16 = vld [vmem:[#allocation6 + $0x38] sm:$0xff]   ;;  %648 = vset.pattern.permute.xlu1 %v798_v37  ;;  %649 = vset.pattern.permute.xlu0 %v798_v37 }
  0x2c   :  { %v214_v17 = vld [vmem:[#allocation3 + $0x4] sm:$0xf]  ;;  %v64_v18 = vld [vmem:[#allocation3] sm:$0xf] }
  0x2d   :  { %619 = vmatpush3.bf16.msra.mxu1 %v652_v3  ;;  %599 = vmatpush3.bf16.msra.mxu0 %v653_v4 }
  0x2e   :  { %620 = vmatprep.subr.bf16.mxu1 %v796_v0  ;;  %600 = vmatprep.subr.bf16.mxu0 %v796_v0 }
  0x31   :  { %621 = vmatpush3.bf16.msra.mxu1 %v654_v5  ;;  %601 = vmatpush3.bf16.msra.mxu0 %v655_v6  ;;  %v667_v20 = vpop.eup %666 }
  0x32   :  { %622 = vmatprep.subr.bf16.mxu1 %v796_v0  ;;  %602 = vmatprep.subr.bf16.mxu0 %v796_v0  ;;  %v51_v22 = vmul.f32 %v667_v20, %v852_v19 }
  0x34   :  { %v53_v23 = vsel %vm52_vm1, %v852_v19, %v51_v22  ;;  %v61_v22 = vlaneseq }
  0x35   :  { %623 = vmatpush3.bf16.msra.mxu1 %v656_v7  ;;  %603 = vmatpush3.bf16.msra.mxu0 %v657_v8  ;;  %v56_v24 = vsel %vm54_vm2, %v55_v21, %v53_v23 }
  0x36   :  { %624 = vmatprep.subr.bf16.mxu1 %v796_v0  ;;  %604 = vmatprep.subr.bf16.mxu0 %v796_v0  ;;  %636 = vpush %v56_v24  ;;  %v880_v24 = vand.u32 127, %v61_v22 }
  0x38   :  { %vm63_vm7 = vcmp.eq.s32.totalorder %v880_v24, 0 }
  0x39   :  { %625 = vmatpush3.bf16.msra.mxu1 %v658_v9  ;;  %605 = vmatpush3.bf16.msra.mxu0 %v659_v10 }
  0x3a   :  { %626 = vmatprep.subr.bf16.mxu1 %v796_v0  ;;  %606 = vmatprep.subr.bf16.mxu0 %v796_v0 }
  0x3d   :  { %627 = vmatpush3.bf16.msra.mxu1 %v660_v11  ;;  %607 = vmatpush3.bf16.msra.mxu0 %v661_v12 }
  0x3e   :  { %628 = vmatprep.subr.bf16.mxu1 %v796_v0  ;;  %608 = vmatprep.subr.bf16.mxu0 %v796_v0 }
  0x41   :  { %629 = vmatpush3.bf16.msra.mxu1 %v662_v13  ;;  %609 = vmatpush3.bf16.msra.mxu0 %v663_v14 }
  0x42   :  { %630 = vmatprep.subr.bf16.mxu1 %v796_v0  ;;  %610 = vmatprep.subr.bf16.mxu0 %v796_v0 }
  0x45   :  { %631 = vmatpush3.bf16.msra.mxu1 %v664_v15  ;;  %611 = vmatpush3.bf16.msra.mxu0 %v665_v16 }
  0x48   :  { %633 = vmatmul.mubr.bf16.vlgmr.msra.gmra.mrb[0].mxu1 %v214_v17  ;;  %613 = vmatmul.mubr.bf16.vlgmr.msra.gmra.mrb[0].mxu0 %v64_v18 }
  0x67   :  { %s637_s15 = spop %636 }
  0x68   :  { %v860_v25 = vstv %s637_s15 }
  0x69   :  { %668 = vrcp.f32 %v860_v25 }
  0x73   :  { %v669_v26 = vpop.eup %668 }
  0x74   :  { %638 = vpush %v669_v26 }
  0xa5   :  { %s639_s0 = spop %638 }
  0xa6   :  { %v871_v50 = vstv %s639_s0 }
 0x11b   :  { %v863_v27 = vpop.f32.mrb[0].mxu1  ;;  %v867_v30 = vpop.f32.mrb[0].mxu0 }
 0x11c   :  { %v634_v28 = vpop.f32.mrb[1].mxu1  ;;  %v320_v29 = vmul.f32 %v863_v27, %v863_v27  ;;  %v614_v32 = vpop.f32.mrb[1].mxu0  ;;  %v169_v34 = vmul.f32 %v867_v30, %v867_v30 }
 0x11d   :  { %v317_v31 = vpop.f32.mrb[2].mxu1  ;;  %v166_v35 = vpop.f32.mrb[2].mxu0 }
 0x11e   :  { %321 = vadd.xlane.f32.xlu0 %v320_v29  ;;  %v635_v33 = vpop.f32.mrb[3].mxu1  ;;  %v615_v36 = vpop.f32.mrb[3].mxu0  ;;  %v323_v38 = vmul.f32 2.0, %v320_v29  ;;  %v172_v41 = vmul.f32 2.0, %v169_v34 }
 0x122   :  { %170 = vadd.xlane.f32.xlu0 %v169_v34 }
 0x1ab   :  { %v322_v39 = vpop.xlane.xlu0 %321 }
 0x1ac   :  { %v324_v40 = vsub.f32 %v322_v39, %v323_v38 }
 0x1ae   :  { %v325_v42 = vmax.f32 %v324_v40, 1e-08 }
 0x1af   :  { %v171_v43 = vpop.xlane.xlu0 %170 }
 0x1b0   :  { %670 = vrsqrt.f32 %v325_v42  ;;  %v173_v44 = vsub.f32 %v171_v43, %v172_v41  ;;  %vm328_vm3 = vcmp.eq.f32.partialorder %v325_v42, inf  ;;  %v331_v48 = vand.u32 2147483648, %v325_v42 }
 0x1b1   :  { %vm330_vm4 = vcmp.eq.f32.partialorder %v325_v42, 0.0 }
 0x1b2   :  { %v174_v45 = vmax.f32 %v173_v44, 1e-08 }
 0x1b4   :  { %672 = vrsqrt.f32 %v174_v45  ;;  %vm177_vm5 = vcmp.eq.f32.partialorder %v174_v45, inf  ;;  %v180_v54 = vand.u32 2147483648, %v174_v45  ;;  %vm179_vm6 = vcmp.eq.f32.partialorder %v174_v45, 0.0 }
 0x1ba   :  { %v671_v46 = vpop.eup %670 }
 0x1bb   :  { %v327_v47 = vmul.f32 %v671_v46, %v325_v42 }
 0x1bd   :  { %v329_v49 = vsel %vm328_vm3, %v325_v42, %v327_v47 }
 0x1be   :  { %v332_v51 = vsel %vm330_vm4, %v331_v48, %v329_v49  ;;  %v673_v52 = vpop.eup %672 }
 0x1bf   :  { %v333_v53 = vmul.f32 %v332_v51, %v871_v50  ;;  %v176_v55 = vmul.f32 %v673_v52, %v174_v45  ;;  %v898_v52 = vld [vmem:[%s941_s3] sm:$0x1]  ;;  %s799_s3 = smov [#allocation8]  }
 0x1c0   :  { %s549_s18 = sshll.u32 %s799_s3, 4  ;;  %s550_s18 = int_to_ptr.vmem [resolvable:$true] %s549_s18 }
 0x1c1   :  { %v334_v56 = vmul.f32 1.442695, %v333_v53  ;;  %v336_v57 = vsub.f32 0.0, %v333_v53  ;;  %v178_v58 = vsel %vm177_vm5, %v174_v45, %v176_v55  ;;  %s764_s19 = scalar_lea.vmem %s550_s18, 128  ;;  %p769_p3 = scmp.lt.s32.totalorder %s550_s18, %s550_s18 }
 0x1c2   :  { %v181_v60 = vsel %vm179_vm6, %v180_v54, %v178_v58  ;;  %p765_p2 = scmp.ne.s32.totalorder %s550_s18, %s764_s19  ;;  %p770_p4 = scmp.lt.s32.totalorder %s764_s19, %s764_s19 }
 0x1c3   :  { %v337_v59 = vmul.f32 1.442695, %v336_v57  ;;  %674 = vpow2.f32 %v334_v56  ;;  %v183_v61 = vmul.f32 %v871_v50, %v181_v60 }
 0x1c4   :  { %p771_p5 = por %p770_p4, %p769_p3 }
 0x1c5   :  { %676 = vpow2.f32 %v337_v59  ;;  %v184_v62 = vmul.f32 1.442695, %v183_v61  ;;  %v186_v63 = vsub.f32 0.0, %v183_v61 }
 0x1c6   :  { %p772_p6 = pnand %p771_p5, %p765_p2 }
 0x1c7   :  { %v187_v0 = vmul.f32 1.442695, %v186_v63  ;;  %678 = vpow2.f32 %v184_v62 }
 0x1c9   :  { %680 = vpow2.f32 %v187_v0 }
 0x1ca   :  { %682 = vrcp.f32 %v332_v51 }
 0x1cb   :  { %684 = vrcp.f32 %v181_v60 }
 0x1cd   :  { %v675_v1 = vpop.eup %674 }
 0x1cf   :  { %v677_v2 = vpop.eup %676 }
 0x1d0   :  { %v341_v3 = vsub.f32 %v675_v1, %v677_v2  ;;  %v339_v5 = vadd.f32 %v677_v2, %v675_v1 }
 0x1d1   :  { %v679_v6 = vpop.eup %678 }
 0x1d2   :  { %v342_v4 = vmul.f32 0.5, %v341_v3  ;;  %v340_v12 = vmul.f32 0.5, %v339_v5 }
 0x1d3   :  { %v681_v7 = vpop.eup %680 }
 0x1d4   :  { %v343_v8 = vmul.f32 %v342_v4, %v860_v25  ;;  %v683_v9 = vpop.eup %682  ;;  %v191_v10 = vsub.f32 %v679_v6, %v681_v7  ;;  %v189_v13 = vadd.f32 %v681_v7, %v679_v6  ;;  %v352_v17 = vmul.f32 %v340_v12, %v860_v25 }
 0x1d5   :  { %v685_v15 = vpop.eup %684 }
 0x1d6   :  { %v345_v11 = vmul.f32 %v683_v9, %v343_v8  ;;  %v192_v14 = vmul.f32 0.5, %v191_v10  ;;  %v190_v18 = vmul.f32 0.5, %v189_v13 }
 0x1d8   :  { %348 = vperm.xlu1 %648, %v345_v11   ;;  %v194_v16 = vmul.f32 %v192_v14, %v860_v25  ;;  %v203_v21 = vmul.f32 %v190_v18, %v860_v25 }
 0x1da   :  { %v196_v20 = vmul.f32 %v685_v15, %v194_v16 }
 0x1dc   :  { %355 = vperm.xlu1 %648, %v352_v17   ;;  %199 = vperm.xlu0 %649, %v196_v20  }
 0x1e0   :  { %206 = vperm.xlu1 %648, %v203_v21  }
 0x257   :  { %v349_v23 = vpop.permute.xlu1 %348 }
 0x258   :  { %v351_v26 = vmul.f32 %v349_v23, %v863_v27 }
 0x25b   :  { %v356_v28 = vpop.permute.xlu1 %355  ;;  %v200_v42 = vpop.permute.xlu0 %199 }
 0x25c   :  { %v358_v29 = vadd.f32 %v356_v28, %v351_v26  ;;  %v202_v44 = vmul.f32 %v200_v42, %v867_v30  ;;  %v437_v30 = vmul.f32 %v898_v52, %v871_v50 }
 0x25e   :  { %v359_v31 = vsel %vm63_vm7, %v358_v29, %v351_v26  ;;  %v438_v53 = vmax.f32 %v437_v30, 1.0000001 }
 0x25f   :  { %v360_v32 = vmul.f32 %v359_v31, %v871_v50  ;;  %v207_v43 = vpop.permute.xlu1 %206 }
 0x260   :  { %v209_v45 = vadd.f32 %v207_v43, %v202_v44  ;;  %v576_v54 = vadd.f32 -1.0, %v438_v53  ;;  %v440_v55 = vadd.f32 1.0, %v438_v53 }
 0x261   :  { %v361_v33 = vmax.f32 %v360_v32, 1.0000001 }
 0x262   :  { %v890_v48 = vsel %vm63_vm7, %v209_v45, %v202_v44  ;;  %v441_v56 = vmul.f32 %v576_v54, %v440_v55 }
 0x263   :  { %v575_v34 = vadd.f32 -1.0, %v361_v33  ;;  %v363_v35 = vadd.f32 1.0, %v361_v33  ;;  %v383_v59 = vmul.f32 %v890_v48, %v860_v25  ;;  %v388_v6 = vadd.f32 %v890_v48, %v860_v25 }
 0x265   :  { %v364_v36 = vmul.f32 %v575_v34, %v363_v35  ;;  %v385_v61 = vadd.f32 %v383_v59, %v852_v19  ;;  %v389_v7 = vsel %vm63_vm7, %v388_v6, %v202_v44 }
 0x267   :  { %686 = vrsqrt.f32 %v364_v36 }
 0x271   :  { %v687_v37 = vpop.eup %686 }
 0x272   :  { %v366_v38 = vmul.f32 %v687_v37, %v364_v36 }
 0x274   :  { %v367_v39 = vadd.f32 %v366_v38, %v361_v33 }
 0x276   :  { %688 = vlog2.f32 %v367_v39 }
 0x277   :  { %690 = vrsqrt.f32 %v441_v56 }
 0x280   :  { %v689_v40 = vpop.eup %688 }
 0x281   :  { %v369_v27 = vmul.f32 0.6931472, %v689_v40  ;;  %v691_v57 = vpop.eup %690  ;;  %v454_v40 = vshrl.u32 %v61_v22, 7 }
 0x282   :  { %v443_v58 = vmul.f32 %v691_v57, %v441_v56 }
 0x283   :  { %v370_v41 = vmul.f32 %v687_v37, %v369_v27  ;;  %v455_v27 = vsub.s32 0, %v454_v40 }
 0x284   :  { %v444_v60 = vadd.f32 %v443_v58, %v438_v53 }
 0x285   :  { %373 = vperm.xlu1 %648, %v370_v41  }
 0x286   :  { %692 = vlog2.f32 %v444_v60 }
 0x287   :  { %694 = vrcp.f32 %v385_v61 }
 0x290   :  { %v693_v63 = vpop.eup %692 }
 0x291   :  { %v695_v2 = vpop.eup %694  ;;  %v446_v4 = vmul.f32 0.6931472, %v693_v63 }
 0x293   :  { %v447_v5 = vmul.f32 %v691_v57, %v446_v4 }
 0x304   :  { %v374_v46 = vpop.permute.xlu1 %373 }
 0x305   :  { %v376_v47 = vmul.f32 %v374_v46, %v359_v31 }
 0x307   :  { %v377_v49 = vsel %vm63_vm7, 0.0, %v376_v47 }
 0x308   :  { %v378_v51 = vmul.f32 %v377_v49, %v890_v48 }
 0x30a   :  { %379 = vadd.xlane.f32.xlu1 %v378_v51  ;;  %v381_v62 = vmul.f32 2.0, %v378_v51 }
 0x397   :  { %v380_v0 = vpop.xlane.xlu1 %379 }
 0x398   :  { %v382_v1 = vsub.f32 %v380_v0, %v381_v62 }
 0x39a   :  { %v387_v3 = vmul.f32 %v695_v2, %v382_v1 }
 0x39c   :  { %392 = vperm.xlu0 %649, %v387_v3  }
 0x3a0   :  { %450 = vperm.xlu0 %649, %v447_v5  }
 0x41b   :  { %v393_v8 = vpop.permute.xlu0 %392 }
 0x41c   :  { %v395_v9 = vmul.f32 %v393_v8, %v389_v7 }
 0x41e   :  { %v396_v10 = vadd.f32 %v395_v9, %v377_v49 }
 0x41f   :  { %v451_v41 = vpop.permute.xlu0 %450 }
 0x420   :  { %v397_v11 = vmul.f32 %v396_v10, %v396_v10  ;;  %v456_v42 = vrot.slane %v451_v41, %v455_v27 }
 0x422   :  { %398 = vadd.xlane.f32.xlu1 %v397_v11  ;;  %v400_v12 = vmul.f32 2.0, %v397_v11  ;;  %v457_v43 = vmul.f32 %v456_v42, %v898_v52 }
 0x424   :  { %v458_v46 = vsel %vm63_vm7, 0.0, %v457_v43 }
 0x425   :  { %v462_v30 = vrot.slane %v458_v46, %v455_v27 }
 0x4af   :  { %v399_v13 = vpop.xlane.xlu1 %398 }
 0x4b0   :  { %v401_v14 = vsub.f32 %v399_v13, %v400_v12 }
 0x4b2   :  { %v402_v15 = vmax.f32 %v401_v14, 1e-08 }
 0x4b4   :  { %696 = vrsqrt.f32 %v402_v15  ;;  %vm405_vm8 = vcmp.eq.f32.partialorder %v402_v15, inf  ;;  %v408_v18 = vand.u32 2147483648, %v402_v15  ;;  %vm407_vm9 = vcmp.eq.f32.partialorder %v402_v15, 0.0 }
 0x4be   :  { %v697_v16 = vpop.eup %696 }
 0x4bf   :  { %v404_v17 = vmul.f32 %v697_v16, %v402_v15 }
 0x4c1   :  { %v406_v20 = vsel %vm405_vm8, %v402_v15, %v404_v17 }
 0x4c2   :  { %v409_v21 = vsel %vm407_vm9, %v408_v18, %v406_v20 }
 0x4c3   :  { %v410_v23 = vmul.f32 %v409_v21, %v871_v50 }
 0x4c5   :  { %v411_v26 = vmul.f32 1.442695, %v410_v23  ;;  %v413_v28 = vsub.f32 0.0, %v410_v23 }
 0x4c7   :  { %v414_v29 = vmul.f32 1.442695, %v413_v28  ;;  %698 = vpow2.f32 %v411_v26 }
 0x4c9   :  { %700 = vpow2.f32 %v414_v29 }
 0x4ca   :  { %702 = vrcp.f32 %v409_v21 }
 0x4d1   :  { %v699_v31 = vpop.eup %698 }
 0x4d3   :  { %v701_v32 = vpop.eup %700 }
 0x4d4   :  { %v416_v33 = vadd.f32 %v701_v32, %v699_v31  ;;  %v418_v34 = vsub.f32 %v699_v31, %v701_v32  ;;  %v703_v38 = vpop.eup %702 }
 0x4d6   :  { %v417_v35 = vmul.f32 0.5, %v416_v33  ;;  %v419_v36 = vmul.f32 0.5, %v418_v34 }
 0x4d8   :  { %422 = vperm.xlu1 %648, %v417_v35   ;;  %v426_v37 = vmul.f32 %v419_v36, %v860_v25 }
 0x4da   :  { %v428_v39 = vmul.f32 %v703_v38, %v426_v37 }
 0x4dc   :  { %431 = vperm.xlu0 %649, %v428_v39  }
 0x557   :  { %v423_v44 = vpop.permute.xlu1 %422 }
 0x558   :  { %v425_v47 = vmul.f32 %v423_v44, %v890_v48 }
 0x55b   :  { %v432_v45 = vpop.permute.xlu0 %431 }
 0x55c   :  { %v434_v49 = vmul.f32 %v432_v45, %v396_v10 }
 0x55e   :  { %v435_v51 = vadd.f32 %v434_v49, %v425_v47 }
 0x560   :  { %v463_v53 = vmul.f32 %v462_v30, %v435_v51  ;;  %v468_v54 = vmul.f32 %v435_v51, %v860_v25  ;;  %v472_v59 = vadd.f32 %v435_v51, %v860_v25 }
 0x562   :  { %464 = vadd.xlane.f32.xlu0 %v463_v53  ;;  %v469_v22 = vadd.f32 %v468_v54, %v852_v19  ;;  %v466_v55 = vmul.f32 2.0, %v463_v53  ;;  %v473_v48 = vsel %vm63_vm7, %v472_v59, %v435_v51 }
 0x564   :  { %704 = vrcp.f32 %v469_v22 }
 0x56e   :  { %v705_v57 = vpop.eup %704 }
 0x5ef   :  { %v465_v56 = vpop.xlane.xlu0 %464 }
 0x5f0   :  { %v467_v52 = vsub.f32 %v465_v56, %v466_v55 }
 0x5f2   :  { %v471_v58 = vmul.f32 %v705_v57, %v467_v52 }
 0x5f4   :  { %476 = vperm.xlu1 %648, %v471_v58  }
 0x673   :  { %v477_v60 = vpop.permute.xlu1 %476 }
 0x674   :  { %v479_v61 = vmul.f32 %v477_v60, %v473_v48 }
 0x676   :  { %v480_v62 = vadd.f32 %v479_v61, %v462_v30 }
 0x678   :  { %v481_v63 = vmul.f32 %v480_v62, %v480_v62 }
 0x67a   :  { %482 = vadd.xlane.f32.xlu1 %v481_v63  ;;  %v484_v0 = vmul.f32 2.0, %v481_v63 }
 0x707   :  { %v483_v1 = vpop.xlane.xlu1 %482 }
 0x708   :  { %v485_v19 = vsub.f32 %v483_v1, %v484_v0 }
 0x70a   :  { %v486_v2 = vmax.f32 %v485_v19, 1e-08 }
 0x70c   :  { %706 = vrsqrt.f32 %v486_v2  ;;  %vm489_vm10 = vcmp.eq.f32.partialorder %v486_v2, inf  ;;  %v492_v5 = vand.u32 2147483648, %v486_v2  ;;  %vm491_vm11 = vcmp.eq.f32.partialorder %v486_v2, 0.0 }
 0x716   :  { %v707_v3 = vpop.eup %706 }
 0x717   :  { %v488_v4 = vmul.f32 %v707_v3, %v486_v2 }
 0x719   :  { %v490_v6 = vsel %vm489_vm10, %v486_v2, %v488_v4 }
 0x71a   :  { %v493_v7 = vsel %vm491_vm11, %v492_v5, %v490_v6 }
 0x71b   :  { %v494_v8 = vmul.f32 %v493_v7, %v871_v50 }
 0x71d   :  { %v495_v9 = vmul.f32 1.442695, %v494_v8  ;;  %v497_v10 = vsub.f32 0.0, %v494_v8 }
 0x71f   :  { %v498_v11 = vmul.f32 1.442695, %v497_v10  ;;  %708 = vpow2.f32 %v495_v9 }
 0x721   :  { %710 = vpow2.f32 %v498_v11 }
 0x722   :  { %712 = vrcp.f32 %v493_v7 }
 0x729   :  { %v709_v12 = vpop.eup %708 }
 0x72b   :  { %v711_v13 = vpop.eup %710 }
 0x72c   :  { %v500_v14 = vadd.f32 %v711_v13, %v709_v12  ;;  %v502_v15 = vsub.f32 %v709_v12, %v711_v13  ;;  %v713_v20 = vpop.eup %712 }
 0x72e   :  { %v501_v16 = vmul.f32 0.5, %v500_v14  ;;  %v503_v17 = vmul.f32 0.5, %v502_v15 }
 0x730   :  { %506 = vperm.xlu0 %649, %v501_v16   ;;  %v510_v18 = vmul.f32 %v503_v17, %v860_v25 }
 0x732   :  { %v512_v21 = vmul.f32 %v713_v20, %v510_v18 }
 0x734   :  { %515 = vperm.xlu1 %648, %v512_v21  }
 0x7af   :  { %v507_v23 = vpop.permute.xlu0 %506 }
 0x7b0   :  { %v509_v28 = vmul.f32 %v507_v23, %v435_v51 }
 0x7b3   :  { %v516_v26 = vpop.permute.xlu1 %515 }
 0x7b4   :  { %v518_v29 = vmul.f32 %v516_v26, %v480_v62 }
 0x7b6   :  { %v519_v31 = vadd.f32 %v518_v29, %v509_v28 }
 0x7b8   :  { %v520_v32 = vmul.f32 %v519_v31, %v871_v50 }
 0x7ba   :  { %v521_v33 = vmax.f32 %v520_v32, 1.0000001 }
 0x7bc   :  { %v577_v34 = vadd.f32 -1.0, %v521_v33  ;;  %v523_v35 = vadd.f32 1.0, %v521_v33 }
 0x7be   :  { %v524_v36 = vmul.f32 %v577_v34, %v523_v35 }
 0x7c0   :  { %714 = vrsqrt.f32 %v524_v36 }
 0x7ca   :  { %v715_v37 = vpop.eup %714 }
 0x7cb   :  { %v526_v38 = vmul.f32 %v715_v37, %v524_v36 }
 0x7cd   :  { %v527_v39 = vadd.f32 %v526_v38, %v521_v33 }
 0x7cf   :  { %716 = vlog2.f32 %v527_v39 }
 0x7d9   :  { %v717_v25 = vpop.eup %716 }
 0x7da   :  { %v529_v40 = vmul.f32 0.6931472, %v717_v25 }
 0x7dc   :  { %v530_v27 = vmul.f32 %v715_v37, %v529_v40 }
 0x7de   :  { %533 = vperm.xlu0 %649, %v530_v27  }
 0x85d   :  { %v534_v41 = vpop.permute.xlu0 %533 }
 0x85e   :  { %v536_v42 = vmul.f32 %v534_v41, %v519_v31 }
 0x860   :  { %v537_v43 = vsel %vm63_vm7, 0.0, %v536_v42 }
 0x861   :  { %v538_v44 = vmul.f32 0.5, %v537_v43 }
 0x863   :  { %718 = vtanh.f32 %v538_v44 }
 0x86d   :  { %v719_v50 = vpop.eup %718 }
 0x86e   :  { %v540_v45 = vmul.f32 0.5, %v719_v50 }
 0x870   :  { %v541_v46 = vadd.f32 0.5, %v540_v45 }
 0x872   :  { %542 = vst [vmem:[#allocation8] sm:$0xff] %v541_v46 }
 0x873   :  { %775 = shalt.err (!%p772_p6)
}
 0x874   :  { %s776_s22 = scalar_lea.hbm %s942_s4, 128 }
 0x875   :  { %p777_p7 = scmp.ne.s32.totalorder %s942_s4, %s776_s22  ;;  %p780_p8 = scmp.lt.u32.totalorder %s776_s22, %s942_s4 }
 0x877   :  { %p782_p9 = pnand %p780_p8, %p777_p7 }
 0x879   :  { %785 = shalt.err (!%p782_p9)
}
 0x87a   :  { %552 = dma.vmem_to_hbm [thread:$0]  %s550_s18, 128, %s942_s4, [#allocation5]  }
 0x87b   :  { %790 = dma.done.wait [#allocation5], 128  }
 0x87c   :  { %791 = vsyncadd [#allocation5], 4294967168 }
 0x87d   :  { %556 = vsyncpa [#allocation4], 1 }
 0x87e   :  { %557 = vsyncpa [#allocation7], 1 }
 0x87f   :  { %558 = vsyncpa [#allocation5], 1 }

// kernel: tpu_custom_call.1
= control target key start
LH: loop header
LB: loop body
LE: loop exit
PB: predicated region body
PF: predicated region fallthrough
CT: control target
= control target key end

     0   :  { %10 = vsyncpa [#allocation4], 0  ;;  %s938_s0 = inlined_call_operand.<no memory space> [shape: f32[1,1], index: 0, kind: input, shape index: {}]   ;;  %s939_s1 = inlined_call_operand.hbm [shape: bf16[2,8,128], index: 1, kind: input, shape index: {}]   ;;  %s940_s2 = inlined_call_operand.hbm [shape: bf16[2,128,128], index: 2, kind: input, shape index: {}]   ;;  %s941_s3 = inlined_call_operand.vmem [shape: f32[1,128], index: 3, kind: input, shape index: {}]   ;;  %s942_s4 = inlined_call_operand.hbm [shape: f32[8,128], index: 4, kind: output, shape index: {}]  }
   0x1   :  { %11 = vsyncpa [#allocation7], 0 }
   0x2   :  { %12 = vsyncpa [#allocation5], 0  ;;  %s792_s15 = smov [#allocation3]   ;;  %s720_s19 = scalar_lea.hbm %s939_s1, 128 }
   0x3   :  { %s20_s16 = sshll.u32 %s792_s15, 4  ;;  %p721_p0 = scmp.ne.s32.totalorder %s939_s1, %s720_s19  ;;  %s21_s16 = int_to_ptr.vmem [resolvable:$true] %s20_s16 }
   0x4   :  { %p724_p1 = scmp.lt.u32.totalorder %s720_s19, %s939_s1 }
   0x6   :  { %p726_p2 = pnand %p724_p1, %p721_p0 }
   0x8   :  { %729 = shalt.err (!%p726_p2)
}
   0x9   :  { %s730_s24 = scalar_lea.vmem %s21_s16, 128  ;;  %p735_p4 = scmp.lt.s32.totalorder %s21_s16, %s21_s16 }
   0xa   :  { %p731_p3 = scmp.ne.s32.totalorder %s21_s16, %s730_s24  ;;  %p736_p5 = scmp.lt.s32.totalorder %s730_s24, %s730_s24 }
   0xc   :  { %p737_p6 = por %p736_p5, %p735_p4 }
   0xe   :  { %p738_p7 = pnand %p737_p6, %p731_p3 }
  0x10   :  { %741 = shalt.err (!%p738_p7)
}
  0x11   :  { %s793_s25 = smov 64   ;;  %s794_s26 = smov 4  }
  0x12   :  { %26 = dma.hbm_to_vmem [thread:$0]  %s939_s1, 128, %s21_s16, [#allocation4], %s793_s25, %s793_s25, %s794_s26  }
  0x13   :  { %s795_s29 = smov [#allocation6]   ;;  %s742_s7 = scalar_lea.hbm %s940_s2, 2048 }
  0x14   :  { %s32_s30 = sshll.u32 %s795_s29, 4  ;;  %p743_p8 = scmp.ne.s32.totalorder %s940_s2, %s742_s7  ;;  %s33_s30 = int_to_ptr.vmem [resolvable:$true] %s32_s30 }
  0x15   :  { %p746_p9 = scmp.lt.u32.totalorder %s742_s7, %s940_s2 }
  0x17   :  { %p748_p10 = pnand %p746_p9, %p743_p8 }
  0x19   :  { %751 = shalt.err (!%p748_p10)
}
  0x1a   :  { %s752_s12 = scalar_lea.vmem %s33_s30, 2048  ;;  %p757_p12 = scmp.lt.s32.totalorder %s33_s30, %s33_s30 }
  0x1b   :  { %p753_p11 = scmp.ne.s32.totalorder %s33_s30, %s752_s12  ;;  %p758_p13 = scmp.lt.s32.totalorder %s752_s12, %s752_s12 }
  0x1d   :  { %p759_p0 = por %p758_p13, %p757_p12 }
  0x1f   :  { %p760_p1 = pnand %p759_p0, %p753_p11 }
  0x21   :  { %763 = shalt.err (!%p760_p1)
}
  0x22   :  { %38 = dma.hbm_to_vmem [thread:$0]  %s940_s2, 2048, %s33_s30, [#allocation7], %s793_s25, %s793_s25, %s794_s26  }
  0x23   :  { %786 = dma.done.wait [#allocation4], 128  }
  0x24   :  { %787 = vsyncadd [#allocation4], 4294967168 }
  0x25   :  { %788 = dma.done.wait [#allocation7], 2048  }
  0x26   :  { %789 = vsyncadd [#allocation7], 4294965248  ;;  %v796_v0 = vmov 0.0   ;;  %vm797_vm0 = vmmov 0   ;;  %v650_v1 = vld [vmem:[#allocation6 + $0x40] sm:$0xff]   ;;  %v652_v3 = vld [vmem:[#allocation6 + $0x48] sm:$0xff]   ;;  %v852_v19 = vstv %s938_s0 }
  0x27   :  { %616 = vmatprep.subr.bf16.mxu1 %v796_v0  ;;  %596 = vmatprep.subr.bf16.mxu0 %v796_v0  ;;  %v651_v2 = vld [vmem:[#allocation6] sm:$0xff]   ;;  %v653_v4 = vld [vmem:[#allocation6 + $0x8] sm:$0xff]   ;;  %v654_v5 = vld [vmem:[#allocation6 + $0x50] sm:$0xff]   ;;  %666 = vrsqrt.f32 %v852_v19  ;;  %vm52_vm1 = vcmp.eq.f32.partialorder %v852_v19, inf  ;;  %v55_v21 = vand.u32 2147483648, %v852_v19  ;;  %vm54_vm2 = vcmp.eq.f32.partialorder %v852_v19, 0.0 }
  0x28   :  { %632 = vmatprep.mubr.msk.bf16.mxu1 %vm797_vm0, %v796_v0  ;;  %612 = vmatprep.mubr.msk.bf16.mxu0 %vm797_vm0, %v796_v0  ;;  %v655_v6 = vld [vmem:[#allocation6 + $0x10] sm:$0xff]   ;;  %v656_v7 = vld [vmem:[#allocation6 + $0x58] sm:$0xff]   ;;  %v658_v9 = vld [vmem:[#allocation6 + $0x60] sm:$0xff]   ;;  %v798_v37 = vmov 0  }
  0x29   :  { %617 = vmatpush3.bf16.msra.mxu1 %v650_v1  ;;  %597 = vmatpush3.bf16.msra.mxu0 %v651_v2  ;;  %v657_v8 = vld [vmem:[#allocation6 + $0x18] sm:$0xff]   ;;  %v659_v10 = vld [vmem:[#allocation6 + $0x20] sm:$0xff]   ;;  %v660_v11 = vld [vmem:[#allocation6 + $0x68] sm:$0xff]  }
  0x2a   :  { %618 = vmatprep.subr.bf16.mxu1 %v796_v0  ;;  %598 = vmatprep.subr.bf16.mxu0 %v796_v0  ;;  %v661_v12 = vld [vmem:[#allocation6 + $0x28] sm:$0xff]   ;;  %v662_v13 = vld [vmem:[#allocation6 + $0x70] sm:$0xff]   ;;  %v664_v15 = vld [vmem:[#allocation6 + $0x78] sm:$0xff]  }
  0x2b   :  { %v663_v14 = vld [vmem:[#allocation6 + $0x30] sm:$0xff]   ;;  %v665_v16 = vld [vmem:[#allocation6 + $0x38] sm:$0xff]   ;;  %648 = vset.pattern.permute.xlu1 %v798_v37  ;;  %649 = vset.pattern.permute.xlu0 %v798_v37 }
  0x2c   :  { %v214_v17 = vld [vmem:[#allocation3 + $0x4] sm:$0xf]  ;;  %v64_v18 = vld [vmem:[#allocation3] sm:$0xf] }
  0x2d   :  { %619 = vmatpush3.bf16.msra.mxu1 %v652_v3  ;;  %599 = vmatpush3.bf16.msra.mxu0 %v653_v4 }
  0x2e   :  { %620 = vmatprep.subr.bf16.mxu1 %v796_v0  ;;  %600 = vmatprep.subr.bf16.mxu0 %v796_v0 }
  0x31   :  { %621 = vmatpush3.bf16.msra.mxu1 %v654_v5  ;;  %601 = vmatpush3.bf16.msra.mxu0 %v655_v6  ;;  %v667_v20 = vpop.eup %666 }
  0x32   :  { %622 = vmatprep.subr.bf16.mxu1 %v796_v0  ;;  %602 = vmatprep.subr.bf16.mxu0 %v796_v0  ;;  %v51_v22 = vmul.f32 %v667_v20, %v852_v19 }
  0x34   :  { %v53_v23 = vsel %vm52_vm1, %v852_v19, %v51_v22  ;;  %v61_v22 = vlaneseq }
  0x35   :  { %623 = vmatpush3.bf16.msra.mxu1 %v656_v7  ;;  %603 = vmatpush3.bf16.msra.mxu0 %v657_v8  ;;  %v56_v24 = vsel %vm54_vm2, %v55_v21, %v53_v23 }
  0x36   :  { %624 = vmatprep.subr.bf16.mxu1 %v796_v0  ;;  %604 = vmatprep.subr.bf16.mxu0 %v796_v0  ;;  %636 = vpush %v56_v24  ;;  %v880_v24 = vand.u32 127, %v61_v22 }
  0x38   :  { %vm63_vm7 = vcmp.eq.s32.totalorder %v880_v24, 0 }
  0x39   :  { %625 = vmatpush3.bf16.msra.mxu1 %v658_v9  ;;  %605 = vmatpush3.bf16.msra.mxu0 %v659_v10 }
  0x3a   :  { %626 = vmatprep.subr.bf16.mxu1 %v796_v0  ;;  %606 = vmatprep.subr.bf16.mxu0 %v796_v0 }
  0x3d   :  { %627 = vmatpush3.bf16.msra.mxu1 %v660_v11  ;;  %607 = vmatpush3.bf16.msra.mxu0 %v661_v12 }
  0x3e   :  { %628 = vmatprep.subr.bf16.mxu1 %v796_v0  ;;  %608 = vmatprep.subr.bf16.mxu0 %v796_v0 }
  0x41   :  { %629 = vmatpush3.bf16.msra.mxu1 %v662_v13  ;;  %609 = vmatpush3.bf16.msra.mxu0 %v663_v14 }
  0x42   :  { %630 = vmatprep.subr.bf16.mxu1 %v796_v0  ;;  %610 = vmatprep.subr.bf16.mxu0 %v796_v0 }
  0x45   :  { %631 = vmatpush3.bf16.msra.mxu1 %v664_v15  ;;  %611 = vmatpush3.bf16.msra.mxu0 %v665_v16 }
  0x48   :  { %633 = vmatmul.mubr.bf16.vlgmr.msra.gmra.mrb[0].mxu1 %v214_v17  ;;  %613 = vmatmul.mubr.bf16.vlgmr.msra.gmra.mrb[0].mxu0 %v64_v18 }
  0x67   :  { %s637_s15 = spop %636 }
  0x68   :  { %v860_v25 = vstv %s637_s15 }
  0x69   :  { %668 = vrcp.f32 %v860_v25 }
  0x73   :  { %v669_v26 = vpop.eup %668 }
  0x74   :  { %638 = vpush %v669_v26 }
  0xa5   :  { %s639_s0 = spop %638 }
  0xa6   :  { %v871_v50 = vstv %s639_s0 }
 0x11b   :  { %v863_v27 = vpop.f32.mrb[0].mxu1  ;;  %v867_v30 = vpop.f32.mrb[0].mxu0 }
 0x11c   :  { %v634_v28 = vpop.f32.mrb[1].mxu1  ;;  %v320_v29 = vmul.f32 %v863_v27, %v863_v27  ;;  %v614_v32 = vpop.f32.mrb[1].mxu0  ;;  %v169_v34 = vmul.f32 %v867_v30, %v867_v30 }
 0x11d   :  { %v317_v31 = vpop.f32.mrb[2].mxu1  ;;  %v166_v35 = vpop.f32.mrb[2].mxu0 }
 0x11e   :  { %321 = vadd.xlane.f32.xlu0 %v320_v29  ;;  %v635_v33 = vpop.f32.mrb[3].mxu1  ;;  %v615_v36 = vpop.f32.mrb[3].mxu0  ;;  %v323_v38 = vmul.f32 2.0, %v320_v29  ;;  %v172_v41 = vmul.f32 2.0, %v169_v34 }
 0x122   :  { %170 = vadd.xlane.f32.xlu0 %v169_v34 }
 0x1ab   :  { %v322_v39 = vpop.xlane.xlu0 %321 }
 0x1ac   :  { %v324_v40 = vsub.f32 %v322_v39, %v323_v38 }
 0x1ae   :  { %v325_v42 = vmax.f32 %v324_v40, 1e-08 }
 0x1af   :  { %v171_v43 = vpop.xlane.xlu0 %170 }
 0x1b0   :  { %670 = vrsqrt.f32 %v325_v42  ;;  %v173_v44 = vsub.f32 %v171_v43, %v172_v41  ;;  %vm328_vm3 = vcmp.eq.f32.partialorder %v325_v42, inf  ;;  %v331_v48 = vand.u32 2147483648, %v325_v42 }
 0x1b1   :  { %vm330_vm4 = vcmp.eq.f32.partialorder %v325_v42, 0.0 }
 0x1b2   :  { %v174_v45 = vmax.f32 %v173_v44, 1e-08 }
 0x1b4   :  { %672 = vrsqrt.f32 %v174_v45  ;;  %vm177_vm5 = vcmp.eq.f32.partialorder %v174_v45, inf  ;;  %v180_v54 = vand.u32 2147483648, %v174_v45  ;;  %vm179_vm6 = vcmp.eq.f32.partialorder %v174_v45, 0.0 }
 0x1ba   :  { %v671_v46 = vpop.eup %670 }
 0x1bb   :  { %v327_v47 = vmul.f32 %v671_v46, %v325_v42 }
 0x1bd   :  { %v329_v49 = vsel %vm328_vm3, %v325_v42, %v327_v47 }
 0x1be   :  { %v332_v51 = vsel %vm330_vm4, %v331_v48, %v329_v49  ;;  %v673_v52 = vpop.eup %672 }
 0x1bf   :  { %v333_v53 = vmul.f32 %v332_v51, %v871_v50  ;;  %v176_v55 = vmul.f32 %v673_v52, %v174_v45  ;;  %v898_v52 = vld [vmem:[%s941_s3] sm:$0x1]  ;;  %s799_s3 = smov [#allocation8]  }
 0x1c0   :  { %s549_s18 = sshll.u32 %s799_s3, 4  ;;  %s550_s18 = int_to_ptr.vmem [resolvable:$true] %s549_s18 }
 0x1c1   :  { %v334_v56 = vmul.f32 1.442695, %v333_v53  ;;  %v336_v57 = vsub.f32 0.0, %v333_v53  ;;  %v178_v58 = vsel %vm177_vm5, %v174_v45, %v176_v55  ;;  %s764_s19 = scalar_lea.vmem %s550_s18, 128  ;;  %p769_p3 = scmp.lt.s32.totalorder %s550_s18, %s550_s18 }
 0x1c2   :  { %v181_v60 = vsel %vm179_vm6, %v180_v54, %v178_v58  ;;  %p765_p2 = scmp.ne.s32.totalorder %s550_s18, %s764_s19  ;;  %p770_p4 = scmp.lt.s32.totalorder %s764_s19, %s764_s19 }
 0x1c3   :  { %v337_v59 = vmul.f32 1.442695, %v336_v57  ;;  %674 = vpow2.f32 %v334_v56  ;;  %v183_v61 = vmul.f32 %v871_v50, %v181_v60 }
 0x1c4   :  { %p771_p5 = por %p770_p4, %p769_p3 }
 0x1c5   :  { %676 = vpow2.f32 %v337_v59  ;;  %v184_v62 = vmul.f32 1.442695, %v183_v61  ;;  %v186_v63 = vsub.f32 0.0, %v183_v61 }
 0x1c6   :  { %p772_p6 = pnand %p771_p5, %p765_p2 }
 0x1c7   :  { %v187_v0 = vmul.f32 1.442695, %v186_v63  ;;  %678 = vpow2.f32 %v184_v62 }
 0x1c9   :  { %680 = vpow2.f32 %v187_v0 }
 0x1ca   :  { %682 = vrcp.f32 %v332_v51 }
 0x1cb   :  { %684 = vrcp.f32 %v181_v60 }
 0x1cd   :  { %v675_v1 = vpop.eup %674 }
 0x1cf   :  { %v677_v2 = vpop.eup %676 }
 0x1d0   :  { %v341_v3 = vsub.f32 %v675_v1, %v677_v2  ;;  %v339_v5 = vadd.f32 %v677_v2, %v675_v1 }
 0x1d1   :  { %v679_v6 = vpop.eup %678 }
 0x1d2   :  { %v342_v4 = vmul.f32 0.5, %v341_v3  ;;  %v340_v12 = vmul.f32 0.5, %v339_v5 }
 0x1d3   :  { %v681_v7 = vpop.eup %680 }
 0x1d4   :  { %v343_v8 = vmul.f32 %v342_v4, %v860_v25  ;;  %v683_v9 = vpop.eup %682  ;;  %v191_v10 = vsub.f32 %v679_v6, %v681_v7  ;;  %v189_v13 = vadd.f32 %v681_v7, %v679_v6  ;;  %v352_v17 = vmul.f32 %v340_v12, %v860_v25 }
 0x1d5   :  { %v685_v15 = vpop.eup %684 }
 0x1d6   :  { %v345_v11 = vmul.f32 %v683_v9, %v343_v8  ;;  %v192_v14 = vmul.f32 0.5, %v191_v10  ;;  %v190_v18 = vmul.f32 0.5, %v189_v13 }
 0x1d8   :  { %348 = vperm.xlu1 %648, %v345_v11   ;;  %v194_v16 = vmul.f32 %v192_v14, %v860_v25  ;;  %v203_v21 = vmul.f32 %v190_v18, %v860_v25 }
 0x1da   :  { %v196_v20 = vmul.f32 %v685_v15, %v194_v16 }
 0x1dc   :  { %355 = vperm.xlu1 %648, %v352_v17   ;;  %199 = vperm.xlu0 %649, %v196_v20  }
 0x1e0   :  { %206 = vperm.xlu1 %648, %v203_v21  }
 0x257   :  { %v349_v23 = vpop.permute.xlu1 %348 }
 0x258   :  { %v351_v26 = vmul.f32 %v349_v23, %v863_v27 }
 0x25b   :  { %v356_v28 = vpop.permute.xlu1 %355  ;;  %v200_v42 = vpop.permute.xlu0 %199 }
 0x25c   :  { %v358_v29 = vadd.f32 %v356_v28, %v351_v26  ;;  %v202_v44 = vmul.f32 %v200_v42, %v867_v30  ;;  %v437_v30 = vmul.f32 %v898_v52, %v871_v50 }
 0x25e   :  { %v359_v31 = vsel %vm63_vm7, %v358_v29, %v351_v26  ;;  %v438_v53 = vmax.f32 %v437_v30, 1.0000001 }
 0x25f   :  { %v360_v32 = vmul.f32 %v359_v31, %v871_v50  ;;  %v207_v43 = vpop.permute.xlu1 %206 }
 0x260   :  { %v209_v45 = vadd.f32 %v207_v43, %v202_v44  ;;  %v576_v54 = vadd.f32 -1.0, %v438_v53  ;;  %v440_v55 = vadd.f32 1.0, %v438_v53 }
 0x261   :  { %v361_v33 = vmax.f32 %v360_v32, 1.0000001 }
 0x262   :  { %v890_v48 = vsel %vm63_vm7, %v209_v45, %v202_v44  ;;  %v441_v56 = vmul.f32 %v576_v54, %v440_v55 }
 0x263   :  { %v575_v34 = vadd.f32 -1.0, %v361_v33  ;;  %v363_v35 = vadd.f32 1.0, %v361_v33  ;;  %v383_v59 = vmul.f32 %v890_v48, %v860_v25  ;;  %v388_v6 = vadd.f32 %v890_v48, %v860_v25 }
 0x265   :  { %v364_v36 = vmul.f32 %v575_v34, %v363_v35  ;;  %v385_v61 = vadd.f32 %v383_v59, %v852_v19  ;;  %v389_v7 = vsel %vm63_vm7, %v388_v6, %v202_v44 }
 0x267   :  { %686 = vrsqrt.f32 %v364_v36 }
 0x271   :  { %v687_v37 = vpop.eup %686 }
 0x272   :  { %v366_v38 = vmul.f32 %v687_v37, %v364_v36 }
 0x274   :  { %v367_v39 = vadd.f32 %v366_v38, %v361_v33 }
 0x276   :  { %688 = vlog2.f32 %v367_v39 }
 0x277   :  { %690 = vrsqrt.f32 %v441_v56 }
 0x280   :  { %v689_v40 = vpop.eup %688 }
 0x281   :  { %v369_v27 = vmul.f32 0.6931472, %v689_v40  ;;  %v691_v57 = vpop.eup %690  ;;  %v454_v40 = vshrl.u32 %v61_v22, 7 }
 0x282   :  { %v443_v58 = vmul.f32 %v691_v57, %v441_v56 }
 0x283   :  { %v370_v41 = vmul.f32 %v687_v37, %v369_v27  ;;  %v455_v27 = vsub.s32 0, %v454_v40 }
 0x284   :  { %v444_v60 = vadd.f32 %v443_v58, %v438_v53 }
 0x285   :  { %373 = vperm.xlu1 %648, %v370_v41  }
 0x286   :  { %692 = vlog2.f32 %v444_v60 }
 0x287   :  { %694 = vrcp.f32 %v385_v61 }
 0x290   :  { %v693_v63 = vpop.eup %692 }
 0x291   :  { %v695_v2 = vpop.eup %694  ;;  %v446_v4 = vmul.f32 0.6931472, %v693_v63 }
 0x293   :  { %v447_v5 = vmul.f32 %v691_v57, %v446_v4 }
 0x304   :  { %v374_v46 = vpop.permute.xlu1 %373 }
 0x305   :  { %v376_v47 = vmul.f32 %v374_v46, %v359_v31 }
 0x307   :  { %v377_v49 = vsel %vm63_vm7, 0.0, %v376_v47 }
 0x308   :  { %v378_v51 = vmul.f32 %v377_v49, %v890_v48 }
 0x30a   :  { %379 = vadd.xlane.f32.xlu1 %v378_v51  ;;  %v381_v62 = vmul.f32 2.0, %v378_v51 }
 0x397   :  { %v380_v0 = vpop.xlane.xlu1 %379 }
 0x398   :  { %v382_v1 = vsub.f32 %v380_v0, %v381_v62 }
 0x39a   :  { %v387_v3 = vmul.f32 %v695_v2, %v382_v1 }
 0x39c   :  { %392 = vperm.xlu0 %649, %v387_v3  }
 0x3a0   :  { %450 = vperm.xlu0 %649, %v447_v5  }
 0x41b   :  { %v393_v8 = vpop.permute.xlu0 %392 }
 0x41c   :  { %v395_v9 = vmul.f32 %v393_v8, %v389_v7 }
 0x41e   :  { %v396_v10 = vadd.f32 %v395_v9, %v377_v49 }
 0x41f   :  { %v451_v41 = vpop.permute.xlu0 %450 }
 0x420   :  { %v397_v11 = vmul.f32 %v396_v10, %v396_v10  ;;  %v456_v42 = vrot.slane %v451_v41, %v455_v27 }
 0x422   :  { %398 = vadd.xlane.f32.xlu1 %v397_v11  ;;  %v400_v12 = vmul.f32 2.0, %v397_v11  ;;  %v457_v43 = vmul.f32 %v456_v42, %v898_v52 }
 0x424   :  { %v458_v46 = vsel %vm63_vm7, 0.0, %v457_v43 }
 0x425   :  { %v462_v30 = vrot.slane %v458_v46, %v455_v27 }
 0x4af   :  { %v399_v13 = vpop.xlane.xlu1 %398 }
 0x4b0   :  { %v401_v14 = vsub.f32 %v399_v13, %v400_v12 }
 0x4b2   :  { %v402_v15 = vmax.f32 %v401_v14, 1e-08 }
 0x4b4   :  { %696 = vrsqrt.f32 %v402_v15  ;;  %vm405_vm8 = vcmp.eq.f32.partialorder %v402_v15, inf  ;;  %v408_v18 = vand.u32 2147483648, %v402_v15  ;;  %vm407_vm9 = vcmp.eq.f32.partialorder %v402_v15, 0.0 }
 0x4be   :  { %v697_v16 = vpop.eup %696 }
 0x4bf   :  { %v404_v17 = vmul.f32 %v697_v16, %v402_v15 }
 0x4c1   :  { %v406_v20 = vsel %vm405_vm8, %v402_v15, %v404_v17 }
 0x4c2   :  { %v409_v21 = vsel %vm407_vm9, %v408_v18, %v406_v20 }
 0x4c3   :  { %v410_v23 = vmul.f32 %v409_v21, %v871_v50 }
 0x4c5   :  { %v411_v26 = vmul.f32 1.442695, %v410_v23  ;;  %v413_v28 = vsub.f32 0.0, %v410_v23 }
 0x4c7   :  { %v414_v29 = vmul.f32 1.442695, %v413_v28  ;;  %698 = vpow2.f32 %v411_v26 }
 0x4c9   :  { %700 = vpow2.f32 %v414_v29 }
 0x4ca   :  { %702 = vrcp.f32 %v409_v21 }
 0x4d1   :  { %v699_v31 = vpop.eup %698 }
 0x4d3   :  { %v701_v32 = vpop.eup %700 }
 0x4d4   :  { %v416_v33 = vadd.f32 %v701_v32, %v699_v31  ;;  %v418_v34 = vsub.f32 %v699_v31, %v701_v32  ;;  %v703_v38 = vpop.eup %702 }
 0x4d6   :  { %v417_v35 = vmul.f32 0.5, %v416_v33  ;;  %v419_v36 = vmul.f32 0.5, %v418_v34 }
 0x4d8   :  { %422 = vperm.xlu1 %648, %v417_v35   ;;  %v426_v37 = vmul.f32 %v419_v36, %v860_v25 }
 0x4da   :  { %v428_v39 = vmul.f32 %v703_v38, %v426_v37 }
 0x4dc   :  { %431 = vperm.xlu0 %649, %v428_v39  }
 0x557   :  { %v423_v44 = vpop.permute.xlu1 %422 }
 0x558   :  { %v425_v47 = vmul.f32 %v423_v44, %v890_v48 }
 0x55b   :  { %v432_v45 = vpop.permute.xlu0 %431 }
 0x55c   :  { %v434_v49 = vmul.f32 %v432_v45, %v396_v10 }
 0x55e   :  { %v435_v51 = vadd.f32 %v434_v49, %v425_v47 }
 0x560   :  { %v463_v53 = vmul.f32 %v462_v30, %v435_v51  ;;  %v468_v54 = vmul.f32 %v435_v51, %v860_v25  ;;  %v472_v59 = vadd.f32 %v435_v51, %v860_v25 }
 0x562   :  { %464 = vadd.xlane.f32.xlu0 %v463_v53  ;;  %v469_v22 = vadd.f32 %v468_v54, %v852_v19  ;;  %v466_v55 = vmul.f32 2.0, %v463_v53  ;;  %v473_v48 = vsel %vm63_vm7, %v472_v59, %v435_v51 }
 0x564   :  { %704 = vrcp.f32 %v469_v22 }
 0x56e   :  { %v705_v57 = vpop.eup %704 }
 0x5ef   :  { %v465_v56 = vpop.xlane.xlu0 %464 }
 0x5f0   :  { %v467_v52 = vsub.f32 %v465_v56, %v466_v55 }
 0x5f2   :  { %v471_v58 = vmul.f32 %v705_v57, %v467_v52 }
 0x5f4   :  { %476 = vperm.xlu1 %648, %v471_v58  }
 0x673   :  { %v477_v60 = vpop.permute.xlu1 %476 }
 0x674   :  { %v479_v61 = vmul.f32 %v477_v60, %v473_v48 }
 0x676   :  { %v480_v62 = vadd.f32 %v479_v61, %v462_v30 }
 0x678   :  { %v481_v63 = vmul.f32 %v480_v62, %v480_v62 }
 0x67a   :  { %482 = vadd.xlane.f32.xlu1 %v481_v63  ;;  %v484_v0 = vmul.f32 2.0, %v481_v63 }
 0x707   :  { %v483_v1 = vpop.xlane.xlu1 %482 }
 0x708   :  { %v485_v19 = vsub.f32 %v483_v1, %v484_v0 }
 0x70a   :  { %v486_v2 = vmax.f32 %v485_v19, 1e-08 }
 0x70c   :  { %706 = vrsqrt.f32 %v486_v2  ;;  %vm489_vm10 = vcmp.eq.f32.partialorder %v486_v2, inf  ;;  %v492_v5 = vand.u32 2147483648, %v486_v2  ;;  %vm491_vm11 = vcmp.eq.f32.partialorder %v486_v2, 0.0 }
 0x716   :  { %v707_v3 = vpop.eup %706 }
 0x717   :  { %v488_v4 = vmul.f32 %v707_v3, %v486_v2 }
 0x719   :  { %v490_v6 = vsel %vm489_vm10, %v486_v2, %v488_v4 }
 0x71a   :  { %v493_v7 = vsel %vm491_vm11, %v492_v5, %v490_v6 }
 0x71b   :  { %v494_v8 = vmul.f32 %v493_v7, %v871_v50 }
 0x71d   :  { %v495_v9 = vmul.f32 1.442695, %v494_v8  ;;  %v497_v10 = vsub.f32 0.0, %v494_v8 }
 0x71f   :  { %v498_v11 = vmul.f32 1.442695, %v497_v10  ;;  %708 = vpow2.f32 %v495_v9 }
 0x721   :  { %710 = vpow2.f32 %v498_v11 }
 0x722   :  { %712 = vrcp.f32 %v493_v7 }
 0x729   :  { %v709_v12 = vpop.eup %708 }
 0x72b   :  { %v711_v13 = vpop.eup %710 }
 0x72c   :  { %v500_v14 = vadd.f32 %v711_v13, %v709_v12  ;;  %v502_v15 = vsub.f32 %v709_v12, %v711_v13  ;;  %v713_v20 = vpop.eup %712 }
 0x72e   :  { %v501_v16 = vmul.f32 0.5, %v500_v14  ;;  %v503_v17 = vmul.f32 0.5, %v502_v15 }
 0x730   :  { %506 = vperm.xlu0 %649, %v501_v16   ;;  %v510_v18 = vmul.f32 %v503_v17, %v860_v25 }
 0x732   :  { %v512_v21 = vmul.f32 %v713_v20, %v510_v18 }
 0x734   :  { %515 = vperm.xlu1 %648, %v512_v21  }
 0x7af   :  { %v507_v23 = vpop.permute.xlu0 %506 }
 0x7b0   :  { %v509_v28 = vmul.f32 %v507_v23, %v435_v51 }
 0x7b3   :  { %v516_v26 = vpop.permute.xlu1 %515 }
 0x7b4   :  { %v518_v29 = vmul.f32 %v516_v26, %v480_v62 }
 0x7b6   :  { %v519_v31 = vadd.f32 %v518_v29, %v509_v28 }
 0x7b8   :  { %v520_v32 = vmul.f32 %v519_v31, %v871_v50 }
 0x7ba   :  { %v521_v33 = vmax.f32 %v520_v32, 1.0000001 }
 0x7bc   :  { %v577_v34 = vadd.f32 -1.0, %v521_v33  ;;  %v523_v35 = vadd.f32 1.0, %v521_v33 }
 0x7be   :  { %v524_v36 = vmul.f32 %v577_v34, %v523_v35 }
 0x7c0   :  { %714 = vrsqrt.f32 %v524_v36 }
 0x7ca   :  { %v715_v37 = vpop.eup %714 }
 0x7cb   :  { %v526_v38 = vmul.f32 %v715_v37, %v524_v36 }
 0x7cd   :  { %v527_v39 = vadd.f32 %v526_v38, %v521_v33 }
 0x7cf   :  { %716 = vlog2.f32 %v527_v39 }
 0x7d9   :  { %v717_v25 = vpop.eup %716 }
 0x7da   :  { %v529_v40 = vmul.f32 0.6931472, %v717_v25 }
 0x7dc   :  { %v530_v27 = vmul.f32 %v715_v37, %v529_v40 }
 0x7de   :  { %533 = vperm.xlu0 %649, %v530_v27  }
 0x85d   :  { %v534_v41 = vpop.permute.xlu0 %533 }
 0x85e   :  { %v536_v42 = vmul.f32 %v534_v41, %v519_v31 }
 0x860   :  { %v537_v43 = vsel %vm63_vm7, 0.0, %v536_v42 }
 0x861   :  { %v538_v44 = vmul.f32 0.5, %v537_v43 }
 0x863   :  { %718 = vtanh.f32 %v538_v44 }
 0x86d   :  { %v719_v50 = vpop.eup %718 }
 0x86e   :  { %v540_v45 = vmul.f32 0.5, %v719_v50 }
 0x870   :  { %v541_v46 = vadd.f32 0.5, %v540_v45 }
 0x872   :  { %542 = vst [vmem:[#allocation8] sm:$0xff] %v541_v46 }
 0x873   :  { %775 = shalt.err (!%p772_p6)
}
 0x874   :  { %s776_s22 = scalar_lea.hbm %s942_s4, 128 }
 0x875   :  { %p777_p7 = scmp.ne.s32.totalorder %s942_s4, %s776_s22  ;;  %p780_p8 = scmp.lt.u32.totalorder %s776_s22, %s942_s4 }
 0x877   :  { %p782_p9 = pnand %p780_p8, %p777_p7 }
 0x879   :  { %785 = shalt.err (!%p782_p9)
}
 0x87a   :  { %552 = dma.vmem_to_hbm [thread:$0]  %s550_s18, 128, %s942_s4, [#allocation5]  }
 0x87b   :  { %790 = dma.done.wait [#allocation5], 128  }
 0x87c   :  { %791 = vsyncadd [#allocation5], 4294967168 }
 0x87d   :  { %556 = vsyncpa [#allocation4], 1 }
 0x87e   :  { %557 = vsyncpa [#allocation7], 1 }
 0x87f   :  { %558 = vsyncpa [#allocation5], 1 }

</bundles_post_ra>
